<compile_context>
chip_gen: v7x
topology: tpu7x:2x2x1
jax: 0.10.0
libtpu: 0.0.40
codegen_flags: <defaults>
</compile_context>

<pallas_src>
import jax
import jax.numpy as jnp
from jax.experimental import pallas as pl
from jax.experimental.pallas import tpu as pltpu

D_IN = 784
D_HID = 512
D_LAT = 100
D_LAT_P = 128            # latent padded to one full lane tile
D_HEADS = 2 * D_LAT_P    # fused [mu | logvar] head width (256)
D_OUT_P = 896            # 784 padded to 7 * 128 for lane-dense output stores


def _leaky_relu(x, slope=0.2):
    return jnp.where(x > 0, x, slope * x)


def _round_up(n, m):
    return ((n + m - 1) // m) * m


# --------------------------------------------------------------------------
# Kernel
# --------------------------------------------------------------------------
def vae_kernel(x_ref, noise_ref,
               w1_ref, b1_ref,
               wh_ref, bh_ref,
               w3_ref, b3_ref,
               w4_ref, b4_ref,
               out_ref, heads_ref):
    # encoder: lin1 + LeakyReLU(0.2).  x arrives f32; cast to bf16 on-chip
    # (removes the wrapper-side cast/pad HBM pass).  f32 accumulation.
    x = x_ref[...].astype(jnp.bfloat16)
    h = jnp.dot(x, w1_ref[...], preferred_element_type=jnp.float32) + b1_ref[...]
    h = _leaky_relu(h)

    # fused mu/logvar head: one 256-wide matmul; emit as a single lane-dense
    # (TB, 256) store (mu in lanes [0:100], logvar in lanes [128:228]).
    heads = jnp.dot(h.astype(jnp.bfloat16), wh_ref[...],
                    preferred_element_type=jnp.float32) + bh_ref[...]
    heads_ref[...] = heads

    # reparameterization in f32: z = mean + exp(0.5 * logvar) * noise.
    mean = heads[:, :D_LAT_P]
    logstd = heads[:, D_LAT_P:]
    z = mean + jnp.exp(0.5 * logstd) * noise_ref[...].astype(jnp.float32)

    # decoder: lin3 + LeakyReLU(0.2), then lin4 (no sigmoid in forward).
    h2 = jnp.dot(z.astype(jnp.bfloat16), w3_ref[...],
                 preferred_element_type=jnp.float32) + b3_ref[...]
    h2 = _leaky_relu(h2)
    out = jnp.dot(h2.astype(jnp.bfloat16), w4_ref[...],
                  preferred_element_type=jnp.float32) + b4_ref[...]

    # bf16 store: halves the largest HBM output stream (f32 accumulation kept).
    out_ref[...] = out.astype(out_ref.dtype)


# --------------------------------------------------------------------------
# Parameters
# --------------------------------------------------------------------------
def init_params(key):
    """Deterministic synthetic init matching nn.Linear shapes (out, in)."""
    def linear(k, fan_in, fan_out):
        kw, kb = jax.random.split(k)
        bound = 1.0 / jnp.sqrt(fan_in)
        w = jax.random.uniform(kw, (fan_out, fan_in), jnp.float32, -bound, bound)
        b = jax.random.uniform(kb, (fan_out,), jnp.float32, -bound, bound)
        return w, b

    k1, k2, k3, k4, k5 = jax.random.split(key, 5)
    return {
        "lin1": linear(k1, D_IN, D_HID),
        "mu": linear(k2, D_HID, D_LAT),
        "logvar": linear(k3, D_HID, D_LAT),
        "lin3": linear(k4, D_LAT, D_HID),
        "lin4": linear(k5, D_HID, D_IN),
    }


def prepare_params(params):
    """One-time prep: transpose to (in,out), fuse/pad heads, cast to bf16."""
    def tw(name):
        w, b = params[name]
        return jnp.asarray(w).T, jnp.asarray(b)

    w1, b1 = tw("lin1")        # (784, 512), (512,)
    wmu, bmu = tw("mu")        # (512, 100), (100,)
    wlv, blv = tw("logvar")    # (512, 100), (100,)
    w3, b3 = tw("lin3")        # (100, 512), (512,)
    w4, b4 = tw("lin4")        # (512, 784), (784,)

    # fused head: [ mu (cols 0:100) | zeros | logvar (cols 128:228) | zeros ]
    wh = jnp.zeros((D_HID, D_HEADS), jnp.float32)
    wh = wh.at[:, :D_LAT].set(wmu).at[:, D_LAT_P:D_LAT_P + D_LAT].set(wlv)
    bh = jnp.zeros((D_HEADS,), jnp.float32)
    bh = bh.at[:D_LAT].set(bmu).at[D_LAT_P:D_LAT_P + D_LAT].set(blv)

    # decoder lin3: pad K 100 -> 128 with zero rows (padded z lanes drop out).
    w3p = jnp.zeros((D_LAT_P, D_HID), jnp.float32).at[:D_LAT, :].set(w3)

    # decoder lin4: pad N 784 -> 896 with zero columns for lane-dense stores.
    w4p = jnp.zeros((D_HID, D_OUT_P), jnp.float32).at[:, :D_IN].set(w4)
    b4p = jnp.zeros((D_OUT_P,), jnp.float32).at[:D_IN].set(b4)

    return {
        "w1": w1.astype(jnp.bfloat16), "b1": b1.reshape(1, -1),
        "wh": wh.astype(jnp.bfloat16), "bh": bh.reshape(1, -1),
        "w3": w3p.astype(jnp.bfloat16), "b3": b3.reshape(1, -1),
        "w4": w4p.astype(jnp.bfloat16), "b4": b4p.reshape(1, -1),
    }


# --------------------------------------------------------------------------
# Forward
# --------------------------------------------------------------------------
def vae_forward(x, noise, prepared, tb=512):
    B = x.shape[0]

    # Batch tiling: n_blocks = cdiv(B, tb); TB rounded up to a sublane (8);
    # pad is at most a handful of rows per block.  Keep >=2 grid blocks for
    # mid/large batches so the "parallel" axis shards across both v7x TCs.
    n_blocks = pl.cdiv(B, tb)
    if n_blocks == 1 and B >= 32:
        n_blocks = 2
    TB = _round_up(pl.cdiv(B, n_blocks), 8)
    B_pad = TB * n_blocks

    # x stays f32 — cast to bf16 inside the kernel.  Only pad batch rows when
    # needed (no-op pass for batch sizes that are an exact tile multiple).
    x_p = x if B_pad == B else jnp.pad(x, ((0, B_pad - B), (0, 0)))
    # noise: bf16 (half the DMA), padded 100 -> 128 lanes (padded lanes hit
    # zero rows of w3, so they never affect the reconstruction).
    noise_p = jnp.pad(noise.astype(jnp.bfloat16),
                      ((0, B_pad - B), (0, D_LAT_P - D_LAT)))

    def act(shape):       # batch-tiled activation
        return pl.BlockSpec(shape, lambda i: (i, 0))

    def res(shape):       # VMEM-resident weight/bias: constant index_map,
        return pl.BlockSpec(shape, lambda i: (0, 0),   # single-buffered
                            pipeline_mode=pl.Buffered(1))

    out_shapes = (
        jax.ShapeDtypeStruct((B_pad, D_OUT_P), jnp.bfloat16),  # reconstruction
        jax.ShapeDtypeStruct((B_pad, D_HEADS), jnp.float32),   # [mu | logvar]
    )

    out, heads = pl.pallas_call(
        vae_kernel,
        out_shape=out_shapes,
        grid=(n_blocks,),
        in_specs=[
            act((TB, D_IN)),               # x (f32)
            act((TB, D_LAT_P)),            # noise (bf16)
            res((D_IN, D_HID)),            # w1
            res((1, D_HID)),               # b1
            res((D_HID, D_HEADS)),         # fused mu/logvar weight
            res((1, D_HEADS)),             # fused mu/logvar bias
            res((D_LAT_P, D_HID)),         # w3
            res((1, D_HID)),               # b3
            res((D_HID, D_OUT_P)),         # w4
            res((1, D_OUT_P)),             # b4
        ],
        out_specs=(
            act((TB, D_OUT_P)),
            act((TB, D_HEADS)),
        ),
        compiler_params=pltpu.CompilerParams(
            dimension_semantics=("parallel",),
            vmem_limit_bytes=48 * 1024 * 1024,   # fits tb up to 1024; <= v7x cap
        ),
    )(x_p, noise_p,
      prepared["w1"], prepared["b1"],
      prepared["wh"], prepared["bh"],
      prepared["w3"], prepared["b3"],
      prepared["w4"], prepared["b4"])

    # Wrapper-side layout plumbing: strip padding, split the fused head.
    recon = out[:B, :D_IN]
    mean = heads[:B, :D_LAT]
    logstd = heads[:B, D_LAT_P:D_LAT_P + D_LAT]
    return recon, mean, logstd


def vae_forward_ref(x, noise, params):
    """Pure-JAX f32 reference (matches the PyTorch forward semantics)."""
    def lin(name, v):
        w, b = params[name]
        return v @ w.T + b

    h = jax.nn.leaky_relu(lin("lin1", x), 0.2)
    mean = lin("mu", h)
    logstd = lin("logvar", h)
    z = mean + jnp.exp(0.5 * logstd) * noise
    h2 = jax.nn.leaky_relu(lin("lin3", z), 0.2)
    out = lin("lin4", h2)
    return out, mean, logstd


if __name__ == "__main__":
    key = jax.random.PRNGKey(0)
    kx, knoise, kparams, kx2, kn2 = jax.random.split(key, 5)

    params = init_params(kparams)
    prepared = prepare_params(params)   # one-time weight prep (no per-call cost)

    # Small deterministic test (single grid block).
    B = 8
    x = jax.random.normal(kx, (B, D_IN), jnp.float32)
    noise = jax.random.normal(knoise, (B, D_LAT), jnp.float32)
    out, mean, logstd = jax.block_until_ready(vae_forward(x, noise, prepared))

    ref_out, ref_mean, ref_logstd = vae_forward_ref(x, noise, params)
    # bf16 matmul operands / bf16 output store -> loose-but-meaningful tol.
    assert jnp.allclose(out, ref_out, atol=5e-2, rtol=5e-2)
    assert jnp.allclose(mean, ref_mean, atol=5e-2, rtol=5e-2)
    assert jnp.allclose(logstd, ref_logstd, atol=5e-2, rtol=5e-2)

    # Larger batch exercising >1 grid block and the minimal batch-padding path.
    B2 = 200
    x2 = jax.random.normal(kx2, (B2, D_IN), jnp.float32)
    noise2 = jax.random.normal(kn2, (B2, D_LAT), jnp.float32)
    out2, mean2, logstd2 = jax.block_until_ready(vae_forward(x2, noise2, prepared))
    r_out2, r_mean2, r_logstd2 = vae_forward_ref(x2, noise2, params)
    assert jnp.allclose(out2, r_out2, atol=5e-2, rtol=5e-2)
    assert jnp.allclose(mean2, r_mean2, atol=5e-2, rtol=5e-2)
    assert jnp.allclose(logstd2, r_logstd2, atol=5e-2, rtol=5e-2)

    print("KERNEL_OK")
</pallas_src>

<mosaic_0001>
module attributes {stable_mosaic.version = 11 : i64} {
  func.func @vae_kernel(%arg0: i32, %arg1: memref<8x784xf32, #tpu.memory_space<vmem>>, %arg2: memref<8x128xbf16, #tpu.memory_space<vmem>>, %arg3: memref<784x512xbf16, #tpu.memory_space<vmem>>, %arg4: memref<1x512xf32, #tpu.memory_space<vmem>>, %arg5: memref<512x256xbf16, #tpu.memory_space<vmem>>, %arg6: memref<1x256xf32, #tpu.memory_space<vmem>>, %arg7: memref<128x512xbf16, #tpu.memory_space<vmem>>, %arg8: memref<1x512xf32, #tpu.memory_space<vmem>>, %arg9: memref<512x896xbf16, #tpu.memory_space<vmem>>, %arg10: memref<1x896xf32, #tpu.memory_space<vmem>>, %arg11: memref<8x896xbf16, #tpu.memory_space<vmem>>, %arg12: memref<8x256xf32, #tpu.memory_space<vmem>>) attributes {dimension_semantics = [#tpu.dimension_semantics<parallel>], iteration_bounds = array<i64: 1>, scalar_prefetch = 0 : i64, scratch_operands = 0 : i64, tpu.core_type = #tpu.core_type<tc>, window_params = [{transform_indices = @transform_0, window_bounds = array<i64: 8, 784>}, {transform_indices = @transform_1, window_bounds = array<i64: 8, 128>}, {pipeline_mode = #tpu.pipeline_mode<synchronous>, transform_indices = @transform_2, window_bounds = array<i64: 784, 512>}, {pipeline_mode = #tpu.pipeline_mode<synchronous>, transform_indices = @transform_3, window_bounds = array<i64: 1, 512>}, {pipeline_mode = #tpu.pipeline_mode<synchronous>, transform_indices = @transform_4, window_bounds = array<i64: 512, 256>}, {pipeline_mode = #tpu.pipeline_mode<synchronous>, transform_indices = @transform_5, window_bounds = array<i64: 1, 256>}, {pipeline_mode = #tpu.pipeline_mode<synchronous>, transform_indices = @transform_6, window_bounds = array<i64: 128, 512>}, {pipeline_mode = #tpu.pipeline_mode<synchronous>, transform_indices = @transform_7, window_bounds = array<i64: 1, 512>}, {pipeline_mode = #tpu.pipeline_mode<synchronous>, transform_indices = @transform_8, window_bounds = array<i64: 512, 896>}, {pipeline_mode = #tpu.pipeline_mode<synchronous>, transform_indices = @transform_9, window_bounds = array<i64: 1, 896>}, {transform_indices = @transform_10, window_bounds = array<i64: 8, 896>}, {transform_indices = @transform_11, window_bounds = array<i64: 8, 256>}]} {
    %c0 = arith.constant 0 : index
    %c0_0 = arith.constant 0 : index
    %0 = vector.load %arg1[%c0, %c0_0] : memref<8x784xf32, #tpu.memory_space<vmem>>, vector<8x784xf32>
    %1 = arith.truncf %0 : vector<8x784xf32> to vector<8x784xbf16>
    %c0_1 = arith.constant 0 : index
    %c0_2 = arith.constant 0 : index
    %2 = vector.load %arg3[%c0_1, %c0_2] : memref<784x512xbf16, #tpu.memory_space<vmem>>, vector<784x512xbf16>
    %cst = arith.constant dense<0.000000e+00> : vector<8x512xf32>
    %3 = tpu.matmul %1, %2, %cst {dimension_numbers = #tpu.dot_dimension_numbers<[1], [0], [0], [1], [0, 0, 1, 1], [], []>} : vector<8x784xbf16>, vector<784x512xbf16>, vector<8x512xf32> -> vector<8x512xf32>
    %c0_3 = arith.constant 0 : index
    %c0_4 = arith.constant 0 : index
    %4 = vector.load %arg4[%c0_3, %c0_4] : memref<1x512xf32, #tpu.memory_space<vmem>>, vector<1x512xf32>
    %5 = vector.broadcast %4 : vector<1x512xf32> to vector<8x512xf32>
    %6 = arith.addf %3, %5 : vector<8x512xf32>
    %cst_5 = arith.constant 0.000000e+00 : f32
    %7 = vector.broadcast %cst_5 : f32 to vector<8x512xf32>
    %8 = arith.cmpf ogt, %6, %7 : vector<8x512xf32>
    %cst_6 = arith.constant 2.000000e-01 : f32
    %9 = vector.broadcast %cst_6 : f32 to vector<8x512xf32>
    %10 = arith.mulf %9, %6 : vector<8x512xf32>
    %11 = arith.select %8, %6, %10 : vector<8x512xi1>, vector<8x512xf32>
    %12 = arith.truncf %11 : vector<8x512xf32> to vector<8x512xbf16>
    %c0_7 = arith.constant 0 : index
    %c0_8 = arith.constant 0 : index
    %13 = vector.load %arg5[%c0_7, %c0_8] : memref<512x256xbf16, #tpu.memory_space<vmem>>, vector<512x256xbf16>
    %cst_9 = arith.constant dense<0.000000e+00> : vector<8x256xf32>
    %14 = tpu.matmul %12, %13, %cst_9 {dimension_numbers = #tpu.dot_dimension_numbers<[1], [0], [0], [1], [0, 0, 1, 1], [], []>} : vector<8x512xbf16>, vector<512x256xbf16>, vector<8x256xf32> -> vector<8x256xf32>
    %c0_10 = arith.constant 0 : index
    %c0_11 = arith.constant 0 : index
    %15 = vector.load %arg6[%c0_10, %c0_11] : memref<1x256xf32, #tpu.memory_space<vmem>>, vector<1x256xf32>
    %16 = vector.broadcast %15 : vector<1x256xf32> to vector<8x256xf32>
    %17 = arith.addf %14, %16 : vector<8x256xf32>
    %c0_12 = arith.constant 0 : index
    %c0_13 = arith.constant 0 : index
    %18 = vector.load %arg12[%c0_12, %c0_13] : memref<8x256xf32, #tpu.memory_space<vmem>>, vector<8x256xf32>
    tpu.vector_store %arg12[%c0_12, %c0_13], %17 {strides = array<i32>} : memref<8x256xf32, #tpu.memory_space<vmem>>, vector<8x256xf32>,
    %19 = vector.extract_strided_slice %17 {offsets = [0, 0], sizes = [8, 128], strides = [1, 1]} : vector<8x256xf32> to vector<8x128xf32>
    %20 = vector.extract_strided_slice %17 {offsets = [0, 128], sizes = [8, 128], strides = [1, 1]} : vector<8x256xf32> to vector<8x128xf32>
    %cst_14 = arith.constant 5.000000e-01 : f32
    %21 = vector.broadcast %cst_14 : f32 to vector<8x128xf32>
    %22 = arith.mulf %21, %20 : vector<8x128xf32>
    %23 = math.exp %22 : vector<8x128xf32>
    %c0_15 = arith.constant 0 : index
    %c0_16 = arith.constant 0 : index
    %24 = vector.load %arg2[%c0_15, %c0_16] : memref<8x128xbf16, #tpu.memory_space<vmem>>, vector<8x128xbf16>
    %25 = arith.extf %24 : vector<8x128xbf16> to vector<8x128xf32>
    %26 = arith.mulf %23, %25 : vector<8x128xf32>
    %27 = arith.addf %19, %26 : vector<8x128xf32>
    %28 = arith.truncf %27 : vector<8x128xf32> to vector<8x128xbf16>
    %c0_17 = arith.constant 0 : index
    %c0_18 = arith.constant 0 : index
    %29 = vector.load %arg7[%c0_17, %c0_18] : memref<128x512xbf16, #tpu.memory_space<vmem>>, vector<128x512xbf16>
    %cst_19 = arith.constant dense<0.000000e+00> : vector<8x512xf32>
    %30 = tpu.matmul %28, %29, %cst_19 {dimension_numbers = #tpu.dot_dimension_numbers<[1], [0], [0], [1], [0, 0, 1, 1], [], []>} : vector<8x128xbf16>, vector<128x512xbf16>, vector<8x512xf32> -> vector<8x512xf32>
    %c0_20 = arith.constant 0 : index
    %c0_21 = arith.constant 0 : index
    %31 = vector.load %arg8[%c0_20, %c0_21] : memref<1x512xf32, #tpu.memory_space<vmem>>, vector<1x512xf32>
    %32 = vector.broadcast %31 : vector<1x512xf32> to vector<8x512xf32>
    %33 = arith.addf %30, %32 : vector<8x512xf32>
    %cst_22 = arith.constant 0.000000e+00 : f32
    %34 = vector.broadcast %cst_22 : f32 to vector<8x512xf32>
    %35 = arith.cmpf ogt, %33, %34 : vector<8x512xf32>
    %cst_23 = arith.constant 2.000000e-01 : f32
    %36 = vector.broadcast %cst_23 : f32 to vector<8x512xf32>
    %37 = arith.mulf %36, %33 : vector<8x512xf32>
    %38 = arith.select %35, %33, %37 : vector<8x512xi1>, vector<8x512xf32>
    %39 = arith.truncf %38 : vector<8x512xf32> to vector<8x512xbf16>
    %c0_24 = arith.constant 0 : index
    %c0_25 = arith.constant 0 : index
    %40 = vector.load %arg9[%c0_24, %c0_25] : memref<512x896xbf16, #tpu.memory_space<vmem>>, vector<512x896xbf16>
    %cst_26 = arith.constant dense<0.000000e+00> : vector<8x896xf32>
    %41 = tpu.matmul %39, %40, %cst_26 {dimension_numbers = #tpu.dot_dimension_numbers<[1], [0], [0], [1], [0, 0, 1, 1], [], []>} : vector<8x512xbf16>, vector<512x896xbf16>, vector<8x896xf32> -> vector<8x896xf32>
    %c0_27 = arith.constant 0 : index
    %c0_28 = arith.constant 0 : index
    %42 = vector.load %arg10[%c0_27, %c0_28] : memref<1x896xf32, #tpu.memory_space<vmem>>, vector<1x896xf32>
    %43 = vector.broadcast %42 : vector<1x896xf32> to vector<8x896xf32>
    %44 = arith.addf %41, %43 : vector<8x896xf32>
    %45 = arith.truncf %44 : vector<8x896xf32> to vector<8x896xbf16>
    %c0_29 = arith.constant 0 : index
    %c0_30 = arith.constant 0 : index
    %46 = vector.load %arg11[%c0_29, %c0_30] : memref<8x896xbf16, #tpu.memory_space<vmem>>, vector<8x896xbf16>
    tpu.vector_store %arg11[%c0_29, %c0_30], %45 {strides = array<i32>} : memref<8x896xbf16, #tpu.memory_space<vmem>>, vector<8x896xbf16>,
    return
  }
  func.func @transform_0(%arg0: i32) -> (i32, i32) {
    %c0_i32 = arith.constant 0 : i32
    %c0_i32_0 = arith.constant 0 : i32
    return %arg0, %c0_i32 : i32, i32
  }
  func.func @transform_1(%arg0: i32) -> (i32, i32) {
    %c0_i32 = arith.constant 0 : i32
    %c0_i32_0 = arith.constant 0 : i32
    return %arg0, %c0_i32 : i32, i32
  }
  func.func @transform_2(%arg0: i32) -> (i32, i32) {
    %c0_i32 = arith.constant 0 : i32
    %c0_i32_0 = arith.constant 0 : i32
    %c0_i32_1 = arith.constant 0 : i32
    return %c0_i32, %c0_i32_0 : i32, i32
  }
  func.func @transform_3(%arg0: i32) -> (i32, i32) {
    %c0_i32 = arith.constant 0 : i32
    %c0_i32_0 = arith.constant 0 : i32
    %c0_i32_1 = arith.constant 0 : i32
    return %c0_i32, %c0_i32_0 : i32, i32
  }
  func.func @transform_4(%arg0: i32) -> (i32, i32) {
    %c0_i32 = arith.constant 0 : i32
    %c0_i32_0 = arith.constant 0 : i32
    %c0_i32_1 = arith.constant 0 : i32
    return %c0_i32, %c0_i32_0 : i32, i32
  }
  func.func @transform_5(%arg0: i32) -> (i32, i32) {
    %c0_i32 = arith.constant 0 : i32
    %c0_i32_0 = arith.constant 0 : i32
    %c0_i32_1 = arith.constant 0 : i32
    return %c0_i32, %c0_i32_0 : i32, i32
  }
  func.func @transform_6(%arg0: i32) -> (i32, i32) {
    %c0_i32 = arith.constant 0 : i32
    %c0_i32_0 = arith.constant 0 : i32
    %c0_i32_1 = arith.constant 0 : i32
    return %c0_i32, %c0_i32_0 : i32, i32
  }
  func.func @transform_7(%arg0: i32) -> (i32, i32) {
    %c0_i32 = arith.constant 0 : i32
    %c0_i32_0 = arith.constant 0 : i32
    %c0_i32_1 = arith.constant 0 : i32
    return %c0_i32, %c0_i32_0 : i32, i32
  }
  func.func @transform_8(%arg0: i32) -> (i32, i32) {
    %c0_i32 = arith.constant 0 : i32
    %c0_i32_0 = arith.constant 0 : i32
    %c0_i32_1 = arith.constant 0 : i32
    return %c0_i32, %c0_i32_0 : i32, i32
  }
  func.func @transform_9(%arg0: i32) -> (i32, i32) {
    %c0_i32 = arith.constant 0 : i32
    %c0_i32_0 = arith.constant 0 : i32
    %c0_i32_1 = arith.constant 0 : i32
    return %c0_i32, %c0_i32_0 : i32, i32
  }
  func.func @transform_10(%arg0: i32) -> (i32, i32) {
    %c0_i32 = arith.constant 0 : i32
    %c0_i32_0 = arith.constant 0 : i32
    return %arg0, %c0_i32 : i32, i32
  }
  func.func @transform_11(%arg0: i32) -> (i32, i32) {
    %c0_i32 = arith.constant 0 : i32
    %c0_i32_0 = arith.constant 0 : i32
    return %arg0, %c0_i32 : i32, i32
  }
}

</mosaic_0001>

<bundles_post_ra>
// kernel: tpu_custom_call.1
= control target key start
LH: loop header
LB: loop body
LE: loop exit
PB: predicated region body
PF: predicated region fallthrough
CT: control target
= control target key end

     0   :  { %17 = vsyncpa [#allocation3], 0  ;;  %s6180_s0 = inlined_call_operand.hbm [shape: f32[8,784], index: 0, kind: input, shape index: {}]   ;;  %s6181_s1 = inlined_call_operand.hbm [shape: bf16[8,128], index: 1, kind: input, shape index: {}]   ;;  %s6182_s2 = inlined_call_operand.hbm [shape: bf16[784,512], index: 2, kind: input, shape index: {}]   ;;  %s6183_s3 = inlined_call_operand.vmem [shape: f32[1,512], index: 3, kind: input, shape index: {}]   ;;  %s6184_s4 = inlined_call_operand.hbm [shape: bf16[512,256], index: 4, kind: input, shape index: {}]   ;;  %s6185_s5 = inlined_call_operand.vmem [shape: f32[1,256], index: 5, kind: input, shape index: {}]   ;;  %s6186_s6 = inlined_call_operand.hbm [shape: bf16[128,512], index: 6, kind: input, shape index: {}]   ;;  %s6187_s7 = inlined_call_operand.vmem [shape: f32[1,512], index: 7, kind: input, shape index: {}]   ;;  %s6188_s8 = inlined_call_operand.hbm [shape: bf16[512,896], index: 8, kind: input, shape index: {}]   ;;  %s6189_s9 = inlined_call_operand.vmem [shape: f32[1,896], index: 9, kind: input, shape index: {}]   ;;  %s6190_s10 = inlined_call_operand.hbm [shape: bf16[8,896], index: 10, kind: output, shape index: {0}]   ;;  %s6191_s11 = inlined_call_operand.hbm [shape: f32[8,256], index: 11, kind: output, shape index: {1}]  }
   0x1   :  { %18 = vsyncpa [#allocation6], 0 }
   0x2   :  { %19 = vsyncpa [#allocation9], 0 }
   0x3   :  { %20 = vsyncpa [#allocation12], 0 }
   0x4   :  { %21 = vsyncpa [#allocation4], 0 }
   0x5   :  { %22 = vsyncpa [#allocation15], 0  ;;  %s5899_s17 = smov [#allocation5]   ;;  %s5900_s19 = smov [#allocation8]  }
   0x6   :  { %s39_s18 = sshll.u32 %s5899_s17, 4  ;;  %s62_s20 = sshll.u32 %s5900_s19, 4  ;;  %s40_s18 = int_to_ptr.vmem [resolvable:$true] %s39_s18  ;;  %s5974_s20 = int_to_ptr.vmem [resolvable:$true] %s62_s20 }
   0x7   :  { %s5711_s23 = scalar_lea.hbm %s6181_s1, 64 }
   0x8   :  { %p5712_p0 = scmp.ne.s32.totalorder %s6181_s1, %s5711_s23  ;;  %p5715_p1 = scmp.lt.u32.totalorder %s5711_s23, %s6181_s1 }
   0xa   :  { %p5717_p2 = pnand %p5715_p1, %p5712_p0 }
   0xc   :  { %5720 = shalt.err (!%p5717_p2)
}
   0xd   :  { %s5721_s28 = scalar_lea.vmem %s40_s18, 64  ;;  %p5726_p4 = scmp.lt.s32.totalorder %s40_s18, %s40_s18 }
   0xe   :  { %p5722_p3 = scmp.ne.s32.totalorder %s40_s18, %s5721_s28  ;;  %p5727_p5 = scmp.lt.s32.totalorder %s5721_s28, %s5721_s28 }
  0x10   :  { %p5728_p6 = por %p5727_p5, %p5726_p4 }
  0x12   :  { %p5729_p7 = pnand %p5728_p6, %p5722_p3 }
  0x14   :  { %5732 = shalt.err (!%p5729_p7)
}
  0x15   :  { %42 = dma.hbm_to_vmem [thread:$0]  %s6181_s1, 64, %s40_s18, [#allocation6]  }
  0x16   :  { %s5733_s14 = scalar_lea.hbm %s6184_s4, 8192 }
  0x17   :  { %p5734_p8 = scmp.ne.s32.totalorder %s6184_s4, %s5733_s14  ;;  %p5737_p9 = scmp.lt.u32.totalorder %s5733_s14, %s6184_s4 }
  0x19   :  { %p5739_p10 = pnand %p5737_p9, %p5734_p8 }
  0x1b   :  { %5742 = shalt.err (!%p5739_p10)
}
  0x1c   :  { %s5743_s21 = scalar_lea.vmem %s5974_s20, 8192  ;;  %p5748_p12 = scmp.lt.s32.totalorder %s5974_s20, %s5974_s20 }
  0x1d   :  { %p5744_p11 = scmp.ne.s32.totalorder %s5974_s20, %s5743_s21  ;;  %p5749_p13 = scmp.lt.s32.totalorder %s5743_s21, %s5743_s21 }
  0x1f   :  { %p5750_p0 = por %p5749_p13, %p5748_p12 }
  0x21   :  { %p5751_p1 = pnand %p5750_p0, %p5744_p11 }
  0x23   :  { %5754 = shalt.err (!%p5751_p1)
}
  0x24   :  { %s5901_s1 = smov 128   ;;  %s5902_s18 = smov 8  }
  0x25   :  { %68 = dma.hbm_to_vmem [thread:$0]  %s6184_s4, 8192, %s5974_s20, [#allocation9], %s5901_s1, %s5901_s1, %s5902_s18  }
  0x26   :  { %s5903_s24 = smov [#allocation2]   ;;  %s5904_s26 = smov [#allocation7]  }
  0x27   :  { %s29_s25 = sshll.u32 %s5903_s24, 4  ;;  %s48_s27 = sshll.u32 %s5904_s26, 4  ;;  %s30_s25 = int_to_ptr.vmem [resolvable:$true] %s29_s25  ;;  %s6005_s27 = int_to_ptr.vmem [resolvable:$true] %s48_s27 }
  0x28   :  { %s5755_s30 = scalar_lea.hbm %s6180_s0, 896 }
  0x29   :  { %p5756_p2 = scmp.ne.s32.totalorder %s6180_s0, %s5755_s30  ;;  %p5759_p3 = scmp.lt.u32.totalorder %s5755_s30, %s6180_s0 }
  0x2b   :  { %p5761_p4 = pnand %p5759_p3, %p5756_p2 }
  0x2d   :  { %5764 = shalt.err (!%p5761_p4)
}
  0x2e   :  { %s5765_s4 = scalar_lea.vmem %s30_s25, 896  ;;  %p5770_p6 = scmp.lt.s32.totalorder %s30_s25, %s30_s25 }
  0x2f   :  { %p5766_p5 = scmp.ne.s32.totalorder %s30_s25, %s5765_s4  ;;  %p5771_p7 = scmp.lt.s32.totalorder %s5765_s4, %s5765_s4 }
  0x31   :  { %p5772_p8 = por %p5771_p7, %p5770_p6 }
  0x33   :  { %p5773_p9 = pnand %p5772_p8, %p5766_p5 }
  0x35   :  { %5776 = shalt.err (!%p5773_p9)
}
  0x36   :  { %32 = dma.hbm_to_vmem [thread:$0]  %s6180_s0, 896, %s30_s25, [#allocation3]  }
  0x37   :  { %s5777_s21 = scalar_lea.hbm %s6182_s2, 25088 }
  0x38   :  { %p5778_p10 = scmp.ne.s32.totalorder %s6182_s2, %s5777_s21  ;;  %p5781_p11 = scmp.lt.u32.totalorder %s5777_s21, %s6182_s2 }
  0x3a   :  { %p5783_p12 = pnand %p5781_p11, %p5778_p10 }
  0x3c   :  { %5786 = shalt.err (!%p5783_p12)
}
  0x3d   :  { %s5787_s24 = scalar_lea.vmem %s6005_s27, 25088  ;;  %p5792_p0 = scmp.lt.s32.totalorder %s6005_s27, %s6005_s27 }
  0x3e   :  { %p5788_p13 = scmp.ne.s32.totalorder %s6005_s27, %s5787_s24  ;;  %p5793_p1 = scmp.lt.s32.totalorder %s5787_s24, %s5787_s24 }
  0x40   :  { %p5794_p2 = por %p5793_p1, %p5792_p0 }
  0x42   :  { %p5795_p3 = pnand %p5794_p2, %p5788_p13 }
  0x44   :  { %5798 = shalt.err (!%p5795_p3)
}
  0x45   :  { %s5905_s0 = smov 256   ;;  %s5906_s25 = smov 16  }
  0x46   :  { %54 = dma.hbm_to_vmem [thread:$0]  %s6182_s2, 25088, %s6005_s27, [#allocation6], %s5905_s0, %s5905_s0, %s5906_s25  }
  0x47   :  { %s5907_s29 = smov [#allocation10]   ;;  %s5908_s12 = smov [#allocation11]  }
  0x48   :  { %s76_s30 = sshll.u32 %s5907_s29, 4  ;;  %s90_s13 = sshll.u32 %s5908_s12, 4  ;;  %s77_s30 = int_to_ptr.vmem [resolvable:$true] %s76_s30  ;;  %s6036_s13 = int_to_ptr.vmem [resolvable:$true] %s90_s13 }
  0x49   :  { %s5799_s4 = scalar_lea.hbm %s6186_s6, 4096 }
  0x4a   :  { %p5800_p4 = scmp.ne.s32.totalorder %s6186_s6, %s5799_s4  ;;  %p5803_p5 = scmp.lt.u32.totalorder %s5799_s4, %s6186_s6 }
  0x4c   :  { %p5805_p6 = pnand %p5803_p5, %p5800_p4 }
  0x4e   :  { %5808 = shalt.err (!%p5805_p6)
}
  0x4f   :  { %s5809_s2 = scalar_lea.vmem %s77_s30, 4096  ;;  %p5814_p8 = scmp.lt.s32.totalorder %s77_s30, %s77_s30 }
  0x50   :  { %p5810_p7 = scmp.ne.s32.totalorder %s77_s30, %s5809_s2  ;;  %p5815_p9 = scmp.lt.s32.totalorder %s5809_s2, %s5809_s2 }
  0x52   :  { %p5816_p10 = por %p5815_p9, %p5814_p8 }
  0x54   :  { %p5817_p11 = pnand %p5816_p10, %p5810_p7 }
  0x56   :  { %5820 = shalt.err (!%p5817_p11)
}
  0x57   :  { %82 = dma.hbm_to_vmem [thread:$0]  %s6186_s6, 4096, %s77_s30, [#allocation9], %s5905_s0, %s5905_s0, %s5906_s25  }
  0x58   :  { %s5821_s22 = scalar_lea.hbm %s6188_s8, 28672 }
  0x59   :  { %p5822_p12 = scmp.ne.s32.totalorder %s6188_s8, %s5821_s22  ;;  %p5825_p13 = scmp.lt.u32.totalorder %s5821_s22, %s6188_s8 }
  0x5b   :  { %p5827_p0 = pnand %p5825_p13, %p5822_p12 }
  0x5d   :  { %5830 = shalt.err (!%p5827_p0)
}
  0x5e   :  { %s5831_s29 = scalar_lea.vmem %s6036_s13, 28672  ;;  %p5836_p2 = scmp.lt.s32.totalorder %s6036_s13, %s6036_s13 }
  0x5f   :  { %p5832_p1 = scmp.ne.s32.totalorder %s6036_s13, %s5831_s29  ;;  %p5837_p3 = scmp.lt.s32.totalorder %s5831_s29, %s5831_s29 }
  0x61   :  { %p5838_p4 = por %p5837_p3, %p5836_p2 }
  0x63   :  { %p5839_p5 = pnand %p5838_p4, %p5832_p1 }
  0x65   :  { %5842 = shalt.err (!%p5839_p5)
}
  0x66   :  { %s5909_s6 = smov 448   ;;  %s5910_s0 = smov 28  }
  0x67   :  { %96 = dma.hbm_to_vmem [thread:$0]  %s6188_s8, 28672, %s6036_s13, [#allocation12], %s5909_s6, %s5909_s6, %s5910_s0  }
  0x68   :  { %5887 = dma.done.wait [#allocation3], 896  }
  0x69   :  { %5888 = vsyncadd [#allocation3], 4294966400 }
  0x6a   :  { %5889 = dma.done.wait [#allocation6], 25152  }
  0x6b   :  { %5890 = vsyncadd [#allocation6], 4294942144 }
  0x6c   :  { %5891 = dma.done.wait [#allocation9], 12288  }
  0x6d   :  { %5892 = vsyncadd [#allocation9], 4294955008 }
  0x6e   :  { %5893 = dma.done.wait [#allocation12], 28672  }
  0x6f   :  { %5894 = vsyncadd [#allocation12], 4294938624  ;;  %v4951_v0 = vld [vmem:[#allocation7 + $0x4] ss:$16 sps:$4 sm:$0xff]   ;;  %v4953_v1 = vld [vmem:[#allocation7 + $0xc] ss:$16 sps:$4 sm:$0xff]  }
  0x70   :  { %1334 = vmatprep.subr.bf16.mxu0 %v4951_v0  ;;  %v4955_v2 = vld [vmem:[#allocation7] ss:$16 sps:$4 sm:$0xff]   ;;  %v4956_v3 = vld [vmem:[#allocation7 + $0x8] ss:$16 sps:$4 sm:$0xff]   ;;  %1498 = vmatprep.subr.bf16.mxu1 %v4953_v1  ;;  %v4957_v4 = vld [vmem:[#allocation7 + $0x24] ss:$16 sps:$4 sm:$0xff]  }
  0x71   :  { %1335 = vmatpush1.bf16.msra.mxu0 %v4955_v2  ;;  %1499 = vmatpush1.bf16.msra.mxu1 %v4956_v3  ;;  %v4959_v5 = vld [vmem:[#allocation7 + $0x2c] ss:$16 sps:$4 sm:$0xff]   ;;  %v4961_v6 = vld [vmem:[#allocation7 + $0x20] ss:$16 sps:$4 sm:$0xff]   ;;  %v4962_v7 = vld [vmem:[#allocation7 + $0x28] ss:$16 sps:$4 sm:$0xff]  }
  0x72   :  { %1336 = vmatprep.subr.bf16.mxu0 %v4957_v4  ;;  %1500 = vmatprep.subr.bf16.mxu1 %v4959_v5  ;;  %v4963_v8 = vld [vmem:[#allocation7 + $0x44] ss:$16 sps:$4 sm:$0xff]   ;;  %v4965_v9 = vld [vmem:[#allocation7 + $0x4c] ss:$16 sps:$4 sm:$0xff]   ;;  %v4967_v10 = vld [vmem:[#allocation7 + $0x40] ss:$16 sps:$4 sm:$0xff]  }
  0x73   :  { %v4968_v11 = vld [vmem:[#allocation7 + $0x48] ss:$16 sps:$4 sm:$0xff]   ;;  %v4969_v12 = vld [vmem:[#allocation7 + $0x64] ss:$16 sps:$4 sm:$0xff]   ;;  %v4971_v13 = vld [vmem:[#allocation7 + $0x6c] ss:$16 sps:$4 sm:$0xff]  }
  0x74   :  { %v4973_v14 = vld [vmem:[#allocation7 + $0x60] ss:$16 sps:$4 sm:$0xff]   ;;  %v4974_v15 = vld [vmem:[#allocation7 + $0x68] ss:$16 sps:$4 sm:$0xff]   ;;  %v4975_v16 = vld [vmem:[#allocation7 + $0x84] ss:$16 sps:$4 sm:$0xff]  }
  0x75   :  { %1337 = vmatpush1.bf16.msra.mxu0 %v4961_v6  ;;  %1501 = vmatpush1.bf16.msra.mxu1 %v4962_v7  ;;  %v4977_v17 = vld [vmem:[#allocation7 + $0x8c] ss:$16 sps:$4 sm:$0xff]   ;;  %v4979_v18 = vld [vmem:[#allocation7 + $0x80] ss:$16 sps:$4 sm:$0xff]   ;;  %v4980_v19 = vld [vmem:[#allocation7 + $0x88] ss:$16 sps:$4 sm:$0xff]  }
  0x76   :  { %1338 = vmatprep.subr.bf16.mxu0 %v4963_v8  ;;  %1502 = vmatprep.subr.bf16.mxu1 %v4965_v9  ;;  %v4981_v20 = vld [vmem:[#allocation7 + $0xa4] ss:$16 sps:$4 sm:$0xff]   ;;  %v4983_v21 = vld [vmem:[#allocation7 + $0xac] ss:$16 sps:$4 sm:$0xff]   ;;  %v4985_v22 = vld [vmem:[#allocation7 + $0xa0] ss:$16 sps:$4 sm:$0xff]  }
  0x77   :  { %v4986_v23 = vld [vmem:[#allocation7 + $0xa8] ss:$16 sps:$4 sm:$0xff]   ;;  %v4987_v24 = vld [vmem:[#allocation7 + $0xc4] ss:$16 sps:$4 sm:$0xff]   ;;  %v4989_v25 = vld [vmem:[#allocation7 + $0xcc] ss:$16 sps:$4 sm:$0xff]  }
  0x78   :  { %v4991_v26 = vld [vmem:[#allocation7 + $0xc0] ss:$16 sps:$4 sm:$0xff]   ;;  %v4992_v27 = vld [vmem:[#allocation7 + $0xc8] ss:$16 sps:$4 sm:$0xff]   ;;  %v4993_v28 = vld [vmem:[#allocation7 + $0xe4] ss:$16 sps:$4 sm:$0xff]  }
  0x79   :  { %1339 = vmatpush1.bf16.msra.mxu0 %v4967_v10  ;;  %1503 = vmatpush1.bf16.msra.mxu1 %v4968_v11  ;;  %v4995_v29 = vld [vmem:[#allocation7 + $0xec] ss:$16 sps:$4 sm:$0xff]   ;;  %v4997_v30 = vld [vmem:[#allocation7 + $0xe0] ss:$16 sps:$4 sm:$0xff]   ;;  %v4998_v31 = vld [vmem:[#allocation7 + $0xe8] ss:$16 sps:$4 sm:$0xff]  }
  0x7a   :  { %1340 = vmatprep.subr.bf16.mxu0 %v4969_v12  ;;  %1504 = vmatprep.subr.bf16.mxu1 %v4971_v13  ;;  %v4999_v32 = vld [vmem:[#allocation7 + $0x104] ss:$16 sps:$4 sm:$0xff]   ;;  %v5001_v33 = vld [vmem:[#allocation7 + $0x10c] ss:$16 sps:$4 sm:$0xff]   ;;  %v5003_v34 = vld [vmem:[#allocation7 + $0x100] ss:$16 sps:$4 sm:$0xff]  }
  0x7b   :  { %v5004_v35 = vld [vmem:[#allocation7 + $0x108] ss:$16 sps:$4 sm:$0xff]   ;;  %v5005_v36 = vld [vmem:[#allocation7 + $0x124] ss:$16 sps:$4 sm:$0xff]   ;;  %v5007_v37 = vld [vmem:[#allocation7 + $0x12c] ss:$16 sps:$4 sm:$0xff]  }
  0x7c   :  { %v5009_v38 = vld [vmem:[#allocation7 + $0x120] ss:$16 sps:$4 sm:$0xff]   ;;  %v5010_v39 = vld [vmem:[#allocation7 + $0x128] ss:$16 sps:$4 sm:$0xff]   ;;  %v5011_v40 = vld [vmem:[#allocation7 + $0x144] ss:$16 sps:$4 sm:$0xff]  }
  0x7d   :  { %1341 = vmatpush1.bf16.msra.mxu0 %v4973_v14  ;;  %1505 = vmatpush1.bf16.msra.mxu1 %v4974_v15  ;;  %v5013_v41 = vld [vmem:[#allocation7 + $0x14c] ss:$16 sps:$4 sm:$0xff]   ;;  %v5015_v42 = vld [vmem:[#allocation7 + $0x140] ss:$16 sps:$4 sm:$0xff]   ;;  %v5016_v43 = vld [vmem:[#allocation7 + $0x148] ss:$16 sps:$4 sm:$0xff]  }
  0x7e   :  { %1342 = vmatprep.subr.bf16.mxu0 %v4975_v16  ;;  %1506 = vmatprep.subr.bf16.mxu1 %v4977_v17  ;;  %v5017_v44 = vld [vmem:[#allocation7 + $0x164] ss:$16 sps:$4 sm:$0xff]   ;;  %v5019_v45 = vld [vmem:[#allocation7 + $0x16c] ss:$16 sps:$4 sm:$0xff]   ;;  %v5021_v47 = vld [vmem:[#allocation7 + $0x160] ss:$16 sps:$4 sm:$0xff]  }
  0x7f   :  { %v119_v46 = vld [vmem:[#allocation2 + $0x8] sm:$0xff]  ;;  %v5022_v49 = vld [vmem:[#allocation7 + $0x168] ss:$16 sps:$4 sm:$0xff]   ;;  %v5023_v50 = vld [vmem:[#allocation7 + $0x184] ss:$16 sps:$4 sm:$0xff]   ;;  %vm1330_vm0 = vcmask 130048  }
  0x80   :  { %v126_v48 = vpack.c.bf16 %v119_v46, %v119_v46  ;;  %v5025_v51 = vld [vmem:[#allocation7 + $0x18c] ss:$16 sps:$4 sm:$0xff]   ;;  %v5027_v52 = vld [vmem:[#allocation7 + $0x180] ss:$16 sps:$4 sm:$0xff]   ;;  %v5028_v53 = vld [vmem:[#allocation7 + $0x188] ss:$16 sps:$4 sm:$0xff]  }
  0x81   :  { %1343 = vmatpush1.bf16.msra.mxu0 %v4979_v18  ;;  %1507 = vmatpush1.bf16.msra.mxu1 %v4980_v19  ;;  %v5029_v54 = vld [vmem:[#allocation7 + $0x1a4] ss:$16 sps:$4 sm:$0xff]   ;;  %v5031_v55 = vld [vmem:[#allocation7 + $0x1ac] ss:$16 sps:$4 sm:$0xff]   ;;  %v5033_v56 = vld [vmem:[#allocation7 + $0x1a0] ss:$16 sps:$4 sm:$0xff]  }
  0x82   :  { %1344 = vmatprep.subr.bf16.mxu0 %v4981_v20  ;;  %1508 = vmatprep.subr.bf16.mxu1 %v4983_v21  ;;  %v5034_v57 = vld [vmem:[#allocation7 + $0x1a8] ss:$16 sps:$4 sm:$0xff]   ;;  %v5035_v58 = vld [vmem:[#allocation7 + $0x1c4] ss:$16 sps:$4 sm:$0xff]   ;;  %v5037_v59 = vld [vmem:[#allocation7 + $0x1cc] ss:$16 sps:$4 sm:$0xff]  }
  0x83   :  { %1366 = vmatprep.mubr.bf16.mxu0 %v126_v48  ;;  %1530 = vmatprep.mubr.bf16.mxu1 %v126_v48  ;;  %v5039_v60 = vld [vmem:[#allocation7 + $0x1c0] ss:$16 sps:$4 sm:$0xff]   ;;  %v5040_v61 = vld [vmem:[#allocation7 + $0x1c8] ss:$16 sps:$4 sm:$0xff]   ;;  %v5041_v62 = vld [vmem:[#allocation7 + $0x1e4] ss:$16 sps:$4 sm:$0xff]  }
  0x84   :  { %v5043_v63 = vld [vmem:[#allocation7 + $0x1ec] ss:$16 sps:$4 sm:$0xff]   ;;  %v5045_v0 = vld [vmem:[#allocation7 + $0x1e0] ss:$16 sps:$4 sm:$0xff]   ;;  %v5046_v1 = vld [vmem:[#allocation7 + $0x1e8] ss:$16 sps:$4 sm:$0xff]  }
  0x85   :  { %1345 = vmatpush1.bf16.msra.mxu0 %v4985_v22  ;;  %1509 = vmatpush1.bf16.msra.mxu1 %v4986_v23  ;;  %v118_v2 = vld [vmem:[#allocation2] sm:$0xff]  ;;  %v5052_v4 = vld [vmem:[#allocation7 + $0x20c] ss:$16 sps:$4 sm:$0xff]   ;;  %v5047_v6 = vld [vmem:[#allocation7 + $0x200] ss:$16 sps:$4 sm:$0xff]  }
  0x86   :  { %1346 = vmatprep.subr.bf16.mxu0 %v4987_v24  ;;  %1510 = vmatprep.subr.bf16.mxu1 %v4989_v25  ;;  %v5049_v3 = vld [vmem:[#allocation7 + $0x204] ss:$16 sps:$4 sm:$0xff]   ;;  %v125_v5 = vpack.c.bf16 %v118_v2, %v118_v2  ;;  %v5050_v7 = vld [vmem:[#allocation7 + $0x208] ss:$16 sps:$4 sm:$0xff]   ;;  %v5058_v9 = vld [vmem:[#allocation7 + $0x22c] ss:$16 sps:$4 sm:$0xff]  }
  0x87   :  { %v5055_v8 = vld [vmem:[#allocation7 + $0x224] ss:$16 sps:$4 sm:$0xff]   ;;  %v5053_v10 = vld [vmem:[#allocation7 + $0x220] ss:$16 sps:$4 sm:$0xff]   ;;  %v5056_v11 = vld [vmem:[#allocation7 + $0x228] ss:$16 sps:$4 sm:$0xff]  }
  0x88   :  { %v5061_v12 = vld [vmem:[#allocation7 + $0x244] ss:$16 sps:$4 sm:$0xff]   ;;  %v5064_v13 = vld [vmem:[#allocation7 + $0x24c] ss:$16 sps:$4 sm:$0xff]   ;;  %v5059_v14 = vld [vmem:[#allocation7 + $0x240] ss:$16 sps:$4 sm:$0xff]  }
  0x89   :  { %1347 = vmatpush1.bf16.msra.mxu0 %v4991_v26  ;;  %1511 = vmatpush1.bf16.msra.mxu1 %v4992_v27  ;;  %v5062_v15 = vld [vmem:[#allocation7 + $0x248] ss:$16 sps:$4 sm:$0xff]   ;;  %v5067_v16 = vld [vmem:[#allocation7 + $0x264] ss:$16 sps:$4 sm:$0xff]   ;;  %v5070_v17 = vld [vmem:[#allocation7 + $0x26c] ss:$16 sps:$4 sm:$0xff]  }
  0x8a   :  { %1348 = vmatprep.subr.bf16.mxu0 %v4993_v28  ;;  %1512 = vmatprep.subr.bf16.mxu1 %v4995_v29  ;;  %v5065_v18 = vld [vmem:[#allocation7 + $0x260] ss:$16 sps:$4 sm:$0xff]   ;;  %v5068_v19 = vld [vmem:[#allocation7 + $0x268] ss:$16 sps:$4 sm:$0xff]   ;;  %v5073_v20 = vld [vmem:[#allocation7 + $0x284] ss:$16 sps:$4 sm:$0xff]  }
  0x8b   :  { %v5076_v21 = vld [vmem:[#allocation7 + $0x28c] ss:$16 sps:$4 sm:$0xff]   ;;  %v5071_v22 = vld [vmem:[#allocation7 + $0x280] ss:$16 sps:$4 sm:$0xff]   ;;  %v5074_v23 = vld [vmem:[#allocation7 + $0x288] ss:$16 sps:$4 sm:$0xff]  }
  0x8c   :  { %v5079_v24 = vld [vmem:[#allocation7 + $0x2a4] ss:$16 sps:$4 sm:$0xff]   ;;  %v5082_v25 = vld [vmem:[#allocation7 + $0x2ac] ss:$16 sps:$4 sm:$0xff]   ;;  %v5077_v26 = vld [vmem:[#allocation7 + $0x2a0] ss:$16 sps:$4 sm:$0xff]  }
  0x8d   :  { %1349 = vmatpush1.bf16.msra.mxu0 %v4997_v30  ;;  %1513 = vmatpush1.bf16.msra.mxu1 %v4998_v31  ;;  %v5080_v27 = vld [vmem:[#allocation7 + $0x2a8] ss:$16 sps:$4 sm:$0xff]   ;;  %v5085_v28 = vld [vmem:[#allocation7 + $0x2c4] ss:$16 sps:$4 sm:$0xff]   ;;  %v5088_v29 = vld [vmem:[#allocation7 + $0x2cc] ss:$16 sps:$4 sm:$0xff]  }
  0x8e   :  { %1350 = vmatprep.subr.bf16.mxu0 %v4999_v32  ;;  %1514 = vmatprep.subr.bf16.mxu1 %v5001_v33  ;;  %v121_v30 = vld [vmem:[#allocation2 + $0x18] sm:$0xff]  ;;  %v5086_v33 = vld [vmem:[#allocation7 + $0x2c8] ss:$16 sps:$4 sm:$0xff]   ;;  %v5109_v46 = vld [vmem:[#allocation7 + $0x344] ss:$16 sps:$4 sm:$0xff]  }
  0x8f   :  { %v5083_v31 = vld [vmem:[#allocation7 + $0x2c0] ss:$16 sps:$4 sm:$0xff]   ;;  %v128_v32 = vpack.c.bf16 %v121_v30, %v121_v30  ;;  %v5139_v2 = vld [vmem:[#allocation7 + $0x3e4] ss:$16 sps:$4 sm:$0xff]  }
  0x90   :  { %v5107_v48 = vld [vmem:[#allocation7 + $0x340] ss:$16 sps:$4 sm:$0xff]   ;;  %v5175_v30 = vld [vmem:[#allocation7 + $0x4a4] ss:$16 sps:$4 sm:$0xff]  }
  0x91   :  { %1351 = vmatpush1.bf16.msra.mxu0 %v5003_v34  ;;  %1515 = vmatpush1.bf16.msra.mxu1 %v5004_v35  ;;  %v5091_v34 = vld [vmem:[#allocation7 + $0x2e4] ss:$16 sps:$4 sm:$0xff]   ;;  %v5094_v35 = vld [vmem:[#allocation7 + $0x2ec] ss:$16 sps:$4 sm:$0xff]  }
  0x92   :  { %1352 = vmatprep.subr.bf16.mxu0 %v5005_v36  ;;  %1516 = vmatprep.subr.bf16.mxu1 %v5007_v37  ;;  %v5089_v36 = vld [vmem:[#allocation7 + $0x2e0] ss:$16 sps:$4 sm:$0xff]   ;;  %v5092_v37 = vld [vmem:[#allocation7 + $0x2e8] ss:$16 sps:$4 sm:$0xff]  }
  0x95   :  { %1353 = vmatpush1.bf16.msra.mxu0 %v5009_v38  ;;  %1517 = vmatpush1.bf16.msra.mxu1 %v5010_v39  ;;  %v5097_v38 = vld [vmem:[#allocation7 + $0x304] ss:$16 sps:$4 sm:$0xff]   ;;  %v5100_v39 = vld [vmem:[#allocation7 + $0x30c] ss:$16 sps:$4 sm:$0xff]  }
  0x96   :  { %1354 = vmatprep.subr.bf16.mxu0 %v5011_v40  ;;  %1518 = vmatprep.subr.bf16.mxu1 %v5013_v41  ;;  %v5095_v40 = vld [vmem:[#allocation7 + $0x300] ss:$16 sps:$4 sm:$0xff]   ;;  %v5098_v41 = vld [vmem:[#allocation7 + $0x308] ss:$16 sps:$4 sm:$0xff]  }
  0x99   :  { %1355 = vmatpush1.bf16.msra.mxu0 %v5015_v42  ;;  %1519 = vmatpush1.bf16.msra.mxu1 %v5016_v43  ;;  %v5103_v42 = vld [vmem:[#allocation7 + $0x324] ss:$16 sps:$4 sm:$0xff]   ;;  %v5106_v43 = vld [vmem:[#allocation7 + $0x32c] ss:$16 sps:$4 sm:$0xff]  }
  0x9a   :  { %1356 = vmatprep.subr.bf16.mxu0 %v5017_v44  ;;  %1520 = vmatprep.subr.bf16.mxu1 %v5019_v45  ;;  %v5101_v44 = vld [vmem:[#allocation7 + $0x320] ss:$16 sps:$4 sm:$0xff]   ;;  %v5104_v45 = vld [vmem:[#allocation7 + $0x328] ss:$16 sps:$4 sm:$0xff]  }
  0x9d   :  { %1357 = vmatpush1.bf16.msra.mxu0 %v5021_v47  ;;  %1521 = vmatpush1.bf16.msra.mxu1 %v5022_v49  ;;  %v5112_v47 = vld [vmem:[#allocation7 + $0x34c] ss:$16 sps:$4 sm:$0xff]   ;;  %v5110_v49 = vld [vmem:[#allocation7 + $0x348] ss:$16 sps:$4 sm:$0xff]  }
  0x9e   :  { %1358 = vmatprep.subr.bf16.mxu0 %v5023_v50  ;;  %1522 = vmatprep.subr.bf16.mxu1 %v5025_v51  ;;  %v5115_v50 = vld [vmem:[#allocation7 + $0x364] ss:$16 sps:$4 sm:$0xff]   ;;  %v5118_v51 = vld [vmem:[#allocation7 + $0x36c] ss:$16 sps:$4 sm:$0xff]  }
  0xa1   :  { %1359 = vmatpush1.bf16.msra.mxu0 %v5027_v52  ;;  %1523 = vmatpush1.bf16.msra.mxu1 %v5028_v53  ;;  %v5113_v52 = vld [vmem:[#allocation7 + $0x360] ss:$16 sps:$4 sm:$0xff]   ;;  %v5116_v53 = vld [vmem:[#allocation7 + $0x368] ss:$16 sps:$4 sm:$0xff]  }
  0xa2   :  { %1360 = vmatprep.subr.bf16.mxu0 %v5029_v54  ;;  %1524 = vmatprep.subr.bf16.mxu1 %v5031_v55  ;;  %v5121_v54 = vld [vmem:[#allocation7 + $0x384] ss:$16 sps:$4 sm:$0xff]   ;;  %v5124_v55 = vld [vmem:[#allocation7 + $0x38c] ss:$16 sps:$4 sm:$0xff]  }
  0xa5   :  { %1361 = vmatpush1.bf16.msra.mxu0 %v5033_v56  ;;  %1525 = vmatpush1.bf16.msra.mxu1 %v5034_v57  ;;  %v5119_v56 = vld [vmem:[#allocation7 + $0x380] ss:$16 sps:$4 sm:$0xff]   ;;  %v5122_v57 = vld [vmem:[#allocation7 + $0x388] ss:$16 sps:$4 sm:$0xff]  }
  0xa6   :  { %1362 = vmatprep.subr.bf16.mxu0 %v5035_v58  ;;  %1526 = vmatprep.subr.bf16.mxu1 %v5037_v59  ;;  %v5127_v58 = vld [vmem:[#allocation7 + $0x3a4] ss:$16 sps:$4 sm:$0xff]   ;;  %v5130_v59 = vld [vmem:[#allocation7 + $0x3ac] ss:$16 sps:$4 sm:$0xff]  }
  0xa9   :  { %1363 = vmatpush1.bf16.msra.mxu0 %v5039_v60  ;;  %1527 = vmatpush1.bf16.msra.mxu1 %v5040_v61  ;;  %v5125_v60 = vld [vmem:[#allocation7 + $0x3a0] ss:$16 sps:$4 sm:$0xff]   ;;  %v5128_v61 = vld [vmem:[#allocation7 + $0x3a8] ss:$16 sps:$4 sm:$0xff]  }
  0xaa   :  { %1364 = vmatprep.subr.bf16.mxu0 %v5041_v62  ;;  %1528 = vmatprep.subr.bf16.mxu1 %v5043_v63  ;;  %v5133_v62 = vld [vmem:[#allocation7 + $0x3c4] ss:$16 sps:$4 sm:$0xff]   ;;  %v5136_v63 = vld [vmem:[#allocation7 + $0x3cc] ss:$16 sps:$4 sm:$0xff]  }
  0xad   :  { %1365 = vmatpush1.bf16.msra.mxu0 %v5045_v0  ;;  %1529 = vmatpush1.bf16.msra.mxu1 %v5046_v1  ;;  %v5131_v0 = vld [vmem:[#allocation7 + $0x3c0] ss:$16 sps:$4 sm:$0xff]   ;;  %v5134_v1 = vld [vmem:[#allocation7 + $0x3c8] ss:$16 sps:$4 sm:$0xff]  }
  0xae   :  { %1375 = vmatprep.subr.bf16.mxu0 %v5049_v3  ;;  %1539 = vmatprep.subr.bf16.mxu1 %v5052_v4  ;;  %v5142_v3 = vld [vmem:[#allocation7 + $0x3ec] ss:$16 sps:$4 sm:$0xff]   ;;  %v5137_v4 = vld [vmem:[#allocation7 + $0x3e0] ss:$16 sps:$4 sm:$0xff]  }
  0xb0   :  { %1367 = vmatmul.mubr.bf16.vlgmr.msra.gmra.mrb[0].mxu0 %v125_v5  ;;  %1531 = vmatmul.mubr.bf16.vlgmr.msra.gmra.mrb[0].mxu1 %v125_v5  ;;  %v5140_v5 = vld [vmem:[#allocation7 + $0x3e8] ss:$16 sps:$4 sm:$0xff]  }
  0xb1   :  { %1376 = vmatpush1.bf16.msra.mxu0 %v5047_v6  ;;  %1540 = vmatpush1.bf16.msra.mxu1 %v5050_v7  ;;  %v5145_v6 = vld [vmem:[#allocation7 + $0x404] ss:$16 sps:$4 sm:$0xff]  }
  0xb2   :  { %1377 = vmatprep.subr.bf16.mxu0 %v5055_v8  ;;  %1541 = vmatprep.subr.bf16.mxu1 %v5058_v9  ;;  %v120_v7 = vld [vmem:[#allocation2 + $0x10] sm:$0xff]  ;;  %v5148_v8 = vld [vmem:[#allocation7 + $0x40c] ss:$16 sps:$4 sm:$0xff]   ;;  %v5143_v9 = vld [vmem:[#allocation7 + $0x400] ss:$16 sps:$4 sm:$0xff]  }
  0xb3   :  { %1407 = vmatprep.mubr.bf16.mxu0 %v128_v32  ;;  %1571 = vmatprep.mubr.bf16.mxu1 %v128_v32  ;;  %v5173_v32 = vld [vmem:[#allocation7 + $0x4a0] ss:$16 sps:$4 sm:$0xff]  }
  0xb5   :  { %1378 = vmatpush1.bf16.msra.mxu0 %v5053_v10  ;;  %1542 = vmatpush1.bf16.msra.mxu1 %v5056_v11  ;;  %v127_v10 = vpack.c.bf16 %v120_v7, %v120_v7  ;;  %v5146_v11 = vld [vmem:[#allocation7 + $0x408] ss:$16 sps:$4 sm:$0xff]   ;;  %v5238_v7 = vld [vmem:[#allocation7 + $0x5ec] ss:$16 sps:$4 sm:$0xff]  }
  0xb6   :  { %1379 = vmatprep.subr.bf16.mxu0 %v5061_v12  ;;  %1543 = vmatprep.subr.bf16.mxu1 %v5064_v13  ;;  %v5151_v12 = vld [vmem:[#allocation7 + $0x424] ss:$16 sps:$4 sm:$0xff]   ;;  %v5154_v13 = vld [vmem:[#allocation7 + $0x42c] ss:$16 sps:$4 sm:$0xff]  }
  0xb9   :  { %1380 = vmatpush1.bf16.msra.mxu0 %v5059_v14  ;;  %1544 = vmatpush1.bf16.msra.mxu1 %v5062_v15  ;;  %v123_v14 = vld [vmem:[#allocation2 + $0x28] sm:$0xff] }
  0xba   :  { %1381 = vmatprep.subr.bf16.mxu0 %v5067_v16  ;;  %1545 = vmatprep.subr.bf16.mxu1 %v5070_v17  ;;  %v130_v15 = vpack.c.bf16 %v123_v14, %v123_v14  ;;  %v5149_v16 = vld [vmem:[#allocation7 + $0x420] ss:$16 sps:$4 sm:$0xff]   ;;  %v5152_v17 = vld [vmem:[#allocation7 + $0x428] ss:$16 sps:$4 sm:$0xff]  }
  0xbb   :  { %v5242_v14 = vld [vmem:[#allocation7 + $0x608] ss:$16 sps:$4 sm:$0xff]  }
  0xbd   :  { %1382 = vmatpush1.bf16.msra.mxu0 %v5065_v18  ;;  %1546 = vmatpush1.bf16.msra.mxu1 %v5068_v19  ;;  %v5157_v18 = vld [vmem:[#allocation7 + $0x444] ss:$16 sps:$4 sm:$0xff]   ;;  %v5160_v19 = vld [vmem:[#allocation7 + $0x44c] ss:$16 sps:$4 sm:$0xff]  }
  0xbe   :  { %1383 = vmatprep.subr.bf16.mxu0 %v5073_v20  ;;  %1547 = vmatprep.subr.bf16.mxu1 %v5076_v21  ;;  %v5155_v20 = vld [vmem:[#allocation7 + $0x440] ss:$16 sps:$4 sm:$0xff]   ;;  %v5158_v21 = vld [vmem:[#allocation7 + $0x448] ss:$16 sps:$4 sm:$0xff]  }
  0xc1   :  { %1384 = vmatpush1.bf16.msra.mxu0 %v5071_v22  ;;  %1548 = vmatpush1.bf16.msra.mxu1 %v5074_v23  ;;  %v5163_v22 = vld [vmem:[#allocation7 + $0x464] ss:$16 sps:$4 sm:$0xff]   ;;  %v5166_v23 = vld [vmem:[#allocation7 + $0x46c] ss:$16 sps:$4 sm:$0xff]  }
  0xc2   :  { %1385 = vmatprep.subr.bf16.mxu0 %v5079_v24  ;;  %1549 = vmatprep.subr.bf16.mxu1 %v5082_v25  ;;  %v5161_v24 = vld [vmem:[#allocation7 + $0x460] ss:$16 sps:$4 sm:$0xff]   ;;  %v5164_v25 = vld [vmem:[#allocation7 + $0x468] ss:$16 sps:$4 sm:$0xff]  }
  0xc5   :  { %1386 = vmatpush1.bf16.msra.mxu0 %v5077_v26  ;;  %1550 = vmatpush1.bf16.msra.mxu1 %v5080_v27  ;;  %v5169_v26 = vld [vmem:[#allocation7 + $0x484] ss:$16 sps:$4 sm:$0xff]   ;;  %v5172_v27 = vld [vmem:[#allocation7 + $0x48c] ss:$16 sps:$4 sm:$0xff]  }
  0xc6   :  { %1387 = vmatprep.subr.bf16.mxu0 %v5085_v28  ;;  %1551 = vmatprep.subr.bf16.mxu1 %v5088_v29  ;;  %v5167_v28 = vld [vmem:[#allocation7 + $0x480] ss:$16 sps:$4 sm:$0xff]   ;;  %v5170_v29 = vld [vmem:[#allocation7 + $0x488] ss:$16 sps:$4 sm:$0xff]  }
  0xc9   :  { %1388 = vmatpush1.bf16.msra.mxu0 %v5083_v31  ;;  %1552 = vmatpush1.bf16.msra.mxu1 %v5086_v33  ;;  %v5178_v31 = vld [vmem:[#allocation7 + $0x4ac] ss:$16 sps:$4 sm:$0xff]   ;;  %v5176_v33 = vld [vmem:[#allocation7 + $0x4a8] ss:$16 sps:$4 sm:$0xff]  }
  0xca   :  { %1389 = vmatprep.subr.bf16.mxu0 %v5091_v34  ;;  %1553 = vmatprep.subr.bf16.mxu1 %v5094_v35  ;;  %v5181_v34 = vld [vmem:[#allocation7 + $0x4c4] ss:$16 sps:$4 sm:$0xff]   ;;  %v5184_v35 = vld [vmem:[#allocation7 + $0x4cc] ss:$16 sps:$4 sm:$0xff]  }
  0xcd   :  { %1390 = vmatpush1.bf16.msra.mxu0 %v5089_v36  ;;  %1554 = vmatpush1.bf16.msra.mxu1 %v5092_v37  ;;  %v5179_v36 = vld [vmem:[#allocation7 + $0x4c0] ss:$16 sps:$4 sm:$0xff]   ;;  %v5182_v37 = vld [vmem:[#allocation7 + $0x4c8] ss:$16 sps:$4 sm:$0xff]  }
  0xce   :  { %1391 = vmatprep.subr.bf16.mxu0 %v5097_v38  ;;  %1555 = vmatprep.subr.bf16.mxu1 %v5100_v39  ;;  %v5187_v38 = vld [vmem:[#allocation7 + $0x4e4] ss:$16 sps:$4 sm:$0xff]   ;;  %v5190_v39 = vld [vmem:[#allocation7 + $0x4ec] ss:$16 sps:$4 sm:$0xff]  }
  0xd1   :  { %1392 = vmatpush1.bf16.msra.mxu0 %v5095_v40  ;;  %1556 = vmatpush1.bf16.msra.mxu1 %v5098_v41  ;;  %v5185_v40 = vld [vmem:[#allocation7 + $0x4e0] ss:$16 sps:$4 sm:$0xff]   ;;  %v5188_v41 = vld [vmem:[#allocation7 + $0x4e8] ss:$16 sps:$4 sm:$0xff]  }
  0xd2   :  { %1393 = vmatprep.subr.bf16.mxu0 %v5103_v42  ;;  %1557 = vmatprep.subr.bf16.mxu1 %v5106_v43  ;;  %v5193_v42 = vld [vmem:[#allocation7 + $0x504] ss:$16 sps:$4 sm:$0xff]   ;;  %v5196_v43 = vld [vmem:[#allocation7 + $0x50c] ss:$16 sps:$4 sm:$0xff]  }
  0xd5   :  { %1394 = vmatpush1.bf16.msra.mxu0 %v5101_v44  ;;  %1558 = vmatpush1.bf16.msra.mxu1 %v5104_v45  ;;  %v5191_v44 = vld [vmem:[#allocation7 + $0x500] ss:$16 sps:$4 sm:$0xff]   ;;  %v5194_v45 = vld [vmem:[#allocation7 + $0x508] ss:$16 sps:$4 sm:$0xff]  }
  0xd6   :  { %1395 = vmatprep.subr.bf16.mxu0 %v5109_v46  ;;  %1559 = vmatprep.subr.bf16.mxu1 %v5112_v47  ;;  %v5199_v46 = vld [vmem:[#allocation7 + $0x524] ss:$16 sps:$4 sm:$0xff]   ;;  %v5202_v47 = vld [vmem:[#allocation7 + $0x52c] ss:$16 sps:$4 sm:$0xff]  }
  0xd9   :  { %1396 = vmatpush1.bf16.msra.mxu0 %v5107_v48  ;;  %1560 = vmatpush1.bf16.msra.mxu1 %v5110_v49  ;;  %v5197_v48 = vld [vmem:[#allocation7 + $0x520] ss:$16 sps:$4 sm:$0xff]   ;;  %v5200_v49 = vld [vmem:[#allocation7 + $0x528] ss:$16 sps:$4 sm:$0xff]  }
  0xda   :  { %1397 = vmatprep.subr.bf16.mxu0 %v5115_v50  ;;  %1561 = vmatprep.subr.bf16.mxu1 %v5118_v51  ;;  %v5205_v50 = vld [vmem:[#allocation7 + $0x544] ss:$16 sps:$4 sm:$0xff]   ;;  %v5208_v51 = vld [vmem:[#allocation7 + $0x54c] ss:$16 sps:$4 sm:$0xff]  }
  0xdd   :  { %1398 = vmatpush1.bf16.msra.mxu0 %v5113_v52  ;;  %1562 = vmatpush1.bf16.msra.mxu1 %v5116_v53  ;;  %v5203_v52 = vld [vmem:[#allocation7 + $0x540] ss:$16 sps:$4 sm:$0xff]   ;;  %v5206_v53 = vld [vmem:[#allocation7 + $0x548] ss:$16 sps:$4 sm:$0xff]  }
  0xde   :  { %1399 = vmatprep.subr.bf16.mxu0 %v5121_v54  ;;  %1563 = vmatprep.subr.bf16.mxu1 %v5124_v55  ;;  %v5211_v54 = vld [vmem:[#allocation7 + $0x564] ss:$16 sps:$4 sm:$0xff]   ;;  %v5214_v55 = vld [vmem:[#allocation7 + $0x56c] ss:$16 sps:$4 sm:$0xff]  }
  0xe1   :  { %1400 = vmatpush1.bf16.msra.mxu0 %v5119_v56  ;;  %1564 = vmatpush1.bf16.msra.mxu1 %v5122_v57  ;;  %v5209_v56 = vld [vmem:[#allocation7 + $0x560] ss:$16 sps:$4 sm:$0xff]   ;;  %v5212_v57 = vld [vmem:[#allocation7 + $0x568] ss:$16 sps:$4 sm:$0xff]  }
  0xe2   :  { %1401 = vmatprep.subr.bf16.mxu0 %v5127_v58  ;;  %1565 = vmatprep.subr.bf16.mxu1 %v5130_v59  ;;  %v5217_v58 = vld [vmem:[#allocation7 + $0x584] ss:$16 sps:$4 sm:$0xff]   ;;  %v5220_v59 = vld [vmem:[#allocation7 + $0x58c] ss:$16 sps:$4 sm:$0xff]  }
  0xe5   :  { %1402 = vmatpush1.bf16.msra.mxu0 %v5125_v60  ;;  %1566 = vmatpush1.bf16.msra.mxu1 %v5128_v61  ;;  %v5215_v60 = vld [vmem:[#allocation7 + $0x580] ss:$16 sps:$4 sm:$0xff]   ;;  %v5218_v61 = vld [vmem:[#allocation7 + $0x588] ss:$16 sps:$4 sm:$0xff]  }
  0xe6   :  { %1403 = vmatprep.subr.bf16.mxu0 %v5133_v62  ;;  %1567 = vmatprep.subr.bf16.mxu1 %v5136_v63  ;;  %v5223_v62 = vld [vmem:[#allocation7 + $0x5a4] ss:$16 sps:$4 sm:$0xff]   ;;  %v5226_v63 = vld [vmem:[#allocation7 + $0x5ac] ss:$16 sps:$4 sm:$0xff]  }
  0xe9   :  { %1404 = vmatpush1.bf16.msra.mxu0 %v5131_v0  ;;  %1568 = vmatpush1.bf16.msra.mxu1 %v5134_v1  ;;  %v5221_v0 = vld [vmem:[#allocation7 + $0x5a0] ss:$16 sps:$4 sm:$0xff]   ;;  %v5224_v1 = vld [vmem:[#allocation7 + $0x5a8] ss:$16 sps:$4 sm:$0xff]  }
  0xea   :  { %1405 = vmatprep.subr.bf16.mxu0 %v5139_v2  ;;  %1569 = vmatprep.subr.bf16.mxu1 %v5142_v3  ;;  %v5229_v2 = vld [vmem:[#allocation7 + $0x5c4] ss:$16 sps:$4 sm:$0xff]   ;;  %v5232_v3 = vld [vmem:[#allocation7 + $0x5cc] ss:$16 sps:$4 sm:$0xff]  }
  0xed   :  { %1406 = vmatpush1.bf16.msra.mxu0 %v5137_v4  ;;  %1570 = vmatpush1.bf16.msra.mxu1 %v5140_v5  ;;  %v5227_v4 = vld [vmem:[#allocation7 + $0x5c0] ss:$16 sps:$4 sm:$0xff]   ;;  %v5230_v5 = vld [vmem:[#allocation7 + $0x5c8] ss:$16 sps:$4 sm:$0xff]  }
  0xee   :  { %1416 = vmatprep.subr.bf16.mxu0 %v5145_v6  ;;  %1580 = vmatprep.subr.bf16.mxu1 %v5148_v8  ;;  %v5235_v6 = vld [vmem:[#allocation7 + $0x5e4] ss:$16 sps:$4 sm:$0xff]   ;;  %v5233_v8 = vld [vmem:[#allocation7 + $0x5e0] ss:$16 sps:$4 sm:$0xff]  }
  0xf0   :  { %1408 = vmatmul.mubr.bf16.vlgmr.msra.gmra.mrb[0].mxu0 %v127_v10  ;;  %1572 = vmatmul.mubr.bf16.vlgmr.msra.gmra.mrb[0].mxu1 %v127_v10  ;;  %v122_v10 = vld [vmem:[#allocation2 + $0x20] sm:$0xff] }
  0xf1   :  { %1417 = vmatpush1.bf16.msra.mxu0 %v5143_v9  ;;  %1581 = vmatpush1.bf16.msra.mxu1 %v5146_v11  ;;  %v5236_v9 = vld [vmem:[#allocation7 + $0x5e8] ss:$16 sps:$4 sm:$0xff]   ;;  %v5241_v11 = vld [vmem:[#allocation7 + $0x604] ss:$16 sps:$4 sm:$0xff]  }
  0xf2   :  { %1418 = vmatprep.subr.bf16.mxu0 %v5151_v12  ;;  %1582 = vmatprep.subr.bf16.mxu1 %v5154_v13  ;;  %v5244_v12 = vld [vmem:[#allocation7 + $0x60c] ss:$16 sps:$4 sm:$0xff]   ;;  %v5239_v13 = vld [vmem:[#allocation7 + $0x600] ss:$16 sps:$4 sm:$0xff]  }
  0xf3   :  { %1448 = vmatprep.mubr.bf16.mxu0 %v130_v15  ;;  %1612 = vmatprep.mubr.bf16.mxu1 %v130_v15  ;;  %v129_v15 = vpack.c.bf16 %v122_v10, %v122_v10 }
  0xf5   :  { %1419 = vmatpush1.bf16.msra.mxu0 %v5149_v16  ;;  %1583 = vmatpush1.bf16.msra.mxu1 %v5152_v17  ;;  %v5247_v16 = vld [vmem:[#allocation8 + $0x4] ss:$8 sps:$4 sm:$0xff]   ;;  %v5911_v17 = vmov 0  }
  0xf6   :  { %1420 = vmatprep.subr.bf16.mxu0 %v5157_v18  ;;  %1584 = vmatprep.subr.bf16.mxu1 %v5160_v19  ;;  %v124_v18 = vld [vmem:[#allocation2 + $0x30] sm:$0xff]  ;;  %v5245_v19 = vld [vmem:[#allocation8] ss:$8 sps:$4 sm:$0xff]  }
  0xf9   :  { %1421 = vmatpush1.bf16.msra.mxu0 %v5155_v20  ;;  %1585 = vmatpush1.bf16.msra.mxu1 %v5158_v21  ;;  %v131_v20 = vpack.c.bf16 %v124_v18, %v124_v18  ;;  %v5250_v21 = vld [vmem:[#allocation8 + $0x14] ss:$8 sps:$4 sm:$0xff]  }
  0xfa   :  { %1422 = vmatprep.subr.bf16.mxu0 %v5163_v22  ;;  %1586 = vmatprep.subr.bf16.mxu1 %v5166_v23  ;;  %v5248_v22 = vld [vmem:[#allocation8 + $0x10] ss:$8 sps:$4 sm:$0xff]   ;;  %v5253_v23 = vld [vmem:[#allocation8 + $0x24] ss:$8 sps:$4 sm:$0xff]  }
  0xfd   :  { %1423 = vmatpush1.bf16.msra.mxu0 %v5161_v24  ;;  %1587 = vmatpush1.bf16.msra.mxu1 %v5164_v25  ;;  %v5251_v24 = vld [vmem:[#allocation8 + $0x20] ss:$8 sps:$4 sm:$0xff]   ;;  %v5256_v25 = vld [vmem:[#allocation8 + $0x34] ss:$8 sps:$4 sm:$0xff]  }
  0xfe   :  { %1424 = vmatprep.subr.bf16.mxu0 %v5169_v26  ;;  %1588 = vmatprep.subr.bf16.mxu1 %v5172_v27  ;;  %v5254_v26 = vld [vmem:[#allocation8 + $0x30] ss:$8 sps:$4 sm:$0xff]   ;;  %v5259_v27 = vld [vmem:[#allocation8 + $0x44] ss:$8 sps:$4 sm:$0xff]  }
 0x101   :  { %1425 = vmatpush1.bf16.msra.mxu0 %v5167_v28  ;;  %1589 = vmatpush1.bf16.msra.mxu1 %v5170_v29  ;;  %v5257_v28 = vld [vmem:[#allocation8 + $0x40] ss:$8 sps:$4 sm:$0xff]   ;;  %v5262_v29 = vld [vmem:[#allocation8 + $0x54] ss:$8 sps:$4 sm:$0xff]  }
 0x102   :  { %1426 = vmatprep.subr.bf16.mxu0 %v5175_v30  ;;  %1590 = vmatprep.subr.bf16.mxu1 %v5178_v31  ;;  %v5260_v30 = vld [vmem:[#allocation8 + $0x50] ss:$8 sps:$4 sm:$0xff]   ;;  %v5265_v31 = vld [vmem:[#allocation8 + $0x64] ss:$8 sps:$4 sm:$0xff]  }
 0x105   :  { %1427 = vmatpush1.bf16.msra.mxu0 %v5173_v32  ;;  %1591 = vmatpush1.bf16.msra.mxu1 %v5176_v33  ;;  %v5263_v32 = vld [vmem:[#allocation8 + $0x60] ss:$8 sps:$4 sm:$0xff]   ;;  %v5268_v33 = vld [vmem:[#allocation8 + $0x74] ss:$8 sps:$4 sm:$0xff]  }
 0x106   :  { %1428 = vmatprep.subr.bf16.mxu0 %v5181_v34  ;;  %1592 = vmatprep.subr.bf16.mxu1 %v5184_v35  ;;  %v5266_v34 = vld [vmem:[#allocation8 + $0x70] ss:$8 sps:$4 sm:$0xff]   ;;  %v5271_v35 = vld [vmem:[#allocation8 + $0x84] ss:$8 sps:$4 sm:$0xff]  }
 0x109   :  { %1429 = vmatpush1.bf16.msra.mxu0 %v5179_v36  ;;  %1593 = vmatpush1.bf16.msra.mxu1 %v5182_v37  ;;  %v5269_v36 = vld [vmem:[#allocation8 + $0x80] ss:$8 sps:$4 sm:$0xff]   ;;  %v5274_v37 = vld [vmem:[#allocation8 + $0x94] ss:$8 sps:$4 sm:$0xff]  }
 0x10a   :  { %1430 = vmatprep.subr.bf16.mxu0 %v5187_v38  ;;  %1594 = vmatprep.subr.bf16.mxu1 %v5190_v39  ;;  %v5272_v38 = vld [vmem:[#allocation8 + $0x90] ss:$8 sps:$4 sm:$0xff]   ;;  %v5277_v39 = vld [vmem:[#allocation8 + $0xa4] ss:$8 sps:$4 sm:$0xff]  }
 0x10d   :  { %1431 = vmatpush1.bf16.msra.mxu0 %v5185_v40  ;;  %1595 = vmatpush1.bf16.msra.mxu1 %v5188_v41  ;;  %v5275_v40 = vld [vmem:[#allocation8 + $0xa0] ss:$8 sps:$4 sm:$0xff]   ;;  %v5280_v41 = vld [vmem:[#allocation8 + $0xb4] ss:$8 sps:$4 sm:$0xff]  }
 0x10e   :  { %1432 = vmatprep.subr.bf16.mxu0 %v5193_v42  ;;  %1596 = vmatprep.subr.bf16.mxu1 %v5196_v43  ;;  %v5278_v42 = vld [vmem:[#allocation8 + $0xb0] ss:$8 sps:$4 sm:$0xff]   ;;  %v5283_v43 = vld [vmem:[#allocation8 + $0xc4] ss:$8 sps:$4 sm:$0xff]  }
 0x111   :  { %1433 = vmatpush1.bf16.msra.mxu0 %v5191_v44  ;;  %1597 = vmatpush1.bf16.msra.mxu1 %v5194_v45  ;;  %v5281_v44 = vld [vmem:[#allocation8 + $0xc0] ss:$8 sps:$4 sm:$0xff]   ;;  %v5286_v45 = vld [vmem:[#allocation8 + $0xd4] ss:$8 sps:$4 sm:$0xff]  }
 0x112   :  { %1434 = vmatprep.subr.bf16.mxu0 %v5199_v46  ;;  %1598 = vmatprep.subr.bf16.mxu1 %v5202_v47  ;;  %v5284_v46 = vld [vmem:[#allocation8 + $0xd0] ss:$8 sps:$4 sm:$0xff]   ;;  %v5289_v47 = vld [vmem:[#allocation8 + $0xe4] ss:$8 sps:$4 sm:$0xff]  }
 0x115   :  { %1435 = vmatpush1.bf16.msra.mxu0 %v5197_v48  ;;  %1599 = vmatpush1.bf16.msra.mxu1 %v5200_v49  ;;  %v5287_v48 = vld [vmem:[#allocation8 + $0xe0] ss:$8 sps:$4 sm:$0xff]   ;;  %v5292_v49 = vld [vmem:[#allocation8 + $0xf4] ss:$8 sps:$4 sm:$0xff]  }
 0x116   :  { %1436 = vmatprep.subr.bf16.mxu0 %v5205_v50  ;;  %1600 = vmatprep.subr.bf16.mxu1 %v5208_v51  ;;  %v5290_v50 = vld [vmem:[#allocation8 + $0xf0] ss:$8 sps:$4 sm:$0xff]   ;;  %v5295_v51 = vld [vmem:[#allocation8 + $0x104] ss:$8 sps:$4 sm:$0xff]  }
 0x119   :  { %1437 = vmatpush1.bf16.msra.mxu0 %v5203_v52  ;;  %1601 = vmatpush1.bf16.msra.mxu1 %v5206_v53  ;;  %v5341_v52 = vld [vmem:[#allocation10] ss:$16 sps:$4 sm:$0xff]   ;;  %v5343_v53 = vld [vmem:[#allocation10 + $0x4] ss:$16 sps:$4 sm:$0xff]  }
 0x11a   :  { %1438 = vmatprep.subr.bf16.mxu0 %v5211_v54  ;;  %1602 = vmatprep.subr.bf16.mxu1 %v5214_v55  ;;  %v5346_v54 = vld [vmem:[#allocation10 + $0x24] ss:$16 sps:$4 sm:$0xff]   ;;  %v5344_v55 = vld [vmem:[#allocation10 + $0x20] ss:$16 sps:$4 sm:$0xff]  }
 0x11d   :  { %1439 = vmatpush1.bf16.msra.mxu0 %v5209_v56  ;;  %1603 = vmatpush1.bf16.msra.mxu1 %v5212_v57  ;;  %v330_v56 = vlaneseq }
 0x11e   :  { %1440 = vmatprep.subr.bf16.mxu0 %v5217_v58  ;;  %1604 = vmatprep.subr.bf16.mxu1 %v5220_v59  ;;  %v6078_v59 = vld [vmem:[%s6183_s3] sm:$0xf] }
 0x11f   :  { %v6070_v57 = vshrl.u32 %v330_v56, 7  ;;  %v5338_v56 = vld [vmem:[#allocation8 + $0x1f0] ss:$8 sps:$4 sm:$0xff]  }
 0x121   :  { %1441 = vmatpush1.bf16.msra.mxu0 %v5215_v60  ;;  %1605 = vmatpush1.bf16.msra.mxu1 %v5218_v61  ;;  %v6073_v58 = vsub.s32 0, %v6070_v57  ;;  %v6081_v60 = vsub.s32 1, %v6070_v57  ;;  %v6084_v61 = vsub.s32 3, %v6070_v57 }
 0x122   :  { %1442 = vmatprep.subr.bf16.mxu0 %v5223_v62  ;;  %1606 = vmatprep.subr.bf16.mxu1 %v5226_v63 }
 0x123   :  { %v333_v62 = vrot.slane %v6078_v59, %v6073_v58  ;;  %v337_v63 = vrot.slane %v6078_v59, %v6081_v60 }
 0x125   :  { %1443 = vmatpush1.bf16.msra.mxu0 %v5221_v0  ;;  %1607 = vmatpush1.bf16.msra.mxu1 %v5224_v1  ;;  %v345_v0 = vrot.slane %v6078_v59, %v6084_v61 }
 0x126   :  { %1444 = vmatprep.subr.bf16.mxu0 %v5229_v2  ;;  %1608 = vmatprep.subr.bf16.mxu1 %v5232_v3 }
 0x129   :  { %1445 = vmatpush1.bf16.msra.mxu0 %v5227_v4  ;;  %1609 = vmatpush1.bf16.msra.mxu1 %v5230_v5 }
 0x12a   :  { %1446 = vmatprep.subr.bf16.mxu0 %v5235_v6  ;;  %1610 = vmatprep.subr.bf16.mxu1 %v5238_v7 }
 0x12d   :  { %1447 = vmatpush1.bf16.msra.mxu0 %v5233_v8  ;;  %1611 = vmatpush1.bf16.msra.mxu1 %v5236_v9 }
 0x12e   :  { %1457 = vmatprep.subr.bf16.mxu0 %v5241_v11  ;;  %1621 = vmatprep.subr.bf16.mxu1 %v5244_v12 }
 0x130   :  { %1449 = vmatmul.mubr.bf16.vlgmr.msra.gmra.mrb[0].mxu0 %v129_v15  ;;  %1613 = vmatmul.mubr.bf16.vlgmr.msra.gmra.mrb[0].mxu1 %v129_v15 }
 0x131   :  { %1458 = vmatpush1.bf16.msra.mxu0 %v5239_v13  ;;  %1622 = vmatpush1.bf16.msra.mxu1 %v5242_v14 }
 0x132   :  { %1489 = vmatprep.mubr.bf16.mxu0 %v5911_v17  ;;  %1653 = vmatprep.mubr.bf16.mxu1 %v5911_v17 }
 0x133   :  { %2074 = vmatprep.subr.bf16.mxu0 %v5247_v16  ;;  %2380 = vmatprep.subr.bf16.mxu1 %v5343_v53  ;;  %v5335_v53 = vld [vmem:[#allocation8 + $0x1e0] ss:$8 sps:$4 sm:$0xff]  }
 0x13c   :  { %4510 = vmatmul.mubr.msk.bf16.vlgmr.msra.gmra.mrb[0].mxu0 %vm1330_vm0, %v131_v20  ;;  %4511 = vmatmul.mubr.msk.bf16.vlgmr.msra.gmra.mrb[0].mxu1 %vm1330_vm0, %v131_v20  ;;  %v5293_v20 = vld [vmem:[#allocation8 + $0x100] ss:$8 sps:$4 sm:$0xff]  }
 0x13d   :  { %2075 = vmatpush1.bf16.msra.mxu0 %v5245_v19  ;;  %2412 = vmatprep.mubr.bf16.mxu1 %v5911_v17 }
 0x13e   :  { %2076 = vmatprep.subr.bf16.mxu0 %v5250_v21  ;;  %2381 = vmatpush1.bf16.msra.mxu1 %v5341_v52 }
 0x13f   :  { %2382 = vmatprep.subr.bf16.mxu1 %v5346_v54  ;;  %v5340_v54 = vld [vmem:[#allocation8 + $0x1f4] ss:$8 sps:$4 sm:$0xff]  }
 0x141   :  { %2077 = vmatpush1.bf16.msra.mxu0 %v5248_v22  ;;  %v5298_v22 = vld [vmem:[#allocation8 + $0x114] ss:$8 sps:$4 sm:$0xff]  }
 0x142   :  { %2078 = vmatprep.subr.bf16.mxu0 %v5253_v23  ;;  %2383 = vmatpush1.bf16.msra.mxu1 %v5344_v55 }
 0x145   :  { %2079 = vmatpush1.bf16.msra.mxu0 %v5251_v24  ;;  %v5296_v24 = vld [vmem:[#allocation8 + $0x110] ss:$8 sps:$4 sm:$0xff]  }
 0x146   :  { %2080 = vmatprep.subr.bf16.mxu0 %v5256_v25  ;;  %v5301_v25 = vld [vmem:[#allocation8 + $0x124] ss:$8 sps:$4 sm:$0xff]  }
 0x149   :  { %2081 = vmatpush1.bf16.msra.mxu0 %v5254_v26  ;;  %v5299_v26 = vld [vmem:[#allocation8 + $0x120] ss:$8 sps:$4 sm:$0xff]  }
 0x14a   :  { %2082 = vmatprep.subr.bf16.mxu0 %v5259_v27  ;;  %v5304_v27 = vld [vmem:[#allocation8 + $0x134] ss:$8 sps:$4 sm:$0xff]  }
 0x14d   :  { %2083 = vmatpush1.bf16.msra.mxu0 %v5257_v28  ;;  %v5302_v28 = vld [vmem:[#allocation8 + $0x130] ss:$8 sps:$4 sm:$0xff]  }
 0x14e   :  { %2084 = vmatprep.subr.bf16.mxu0 %v5262_v29  ;;  %v5307_v29 = vld [vmem:[#allocation8 + $0x144] ss:$8 sps:$4 sm:$0xff]  }
 0x151   :  { %2085 = vmatpush1.bf16.msra.mxu0 %v5260_v30  ;;  %v5305_v30 = vld [vmem:[#allocation8 + $0x140] ss:$8 sps:$4 sm:$0xff]  }
 0x152   :  { %2086 = vmatprep.subr.bf16.mxu0 %v5265_v31  ;;  %v5310_v31 = vld [vmem:[#allocation8 + $0x154] ss:$8 sps:$4 sm:$0xff]  }
 0x155   :  { %2087 = vmatpush1.bf16.msra.mxu0 %v5263_v32  ;;  %v5308_v32 = vld [vmem:[#allocation8 + $0x150] ss:$8 sps:$4 sm:$0xff]  }
 0x156   :  { %2088 = vmatprep.subr.bf16.mxu0 %v5268_v33  ;;  %v5313_v33 = vld [vmem:[#allocation8 + $0x164] ss:$8 sps:$4 sm:$0xff]  }
 0x159   :  { %2089 = vmatpush1.bf16.msra.mxu0 %v5266_v34  ;;  %v5311_v34 = vld [vmem:[#allocation8 + $0x160] ss:$8 sps:$4 sm:$0xff]  }
 0x15a   :  { %2090 = vmatprep.subr.bf16.mxu0 %v5271_v35  ;;  %v5316_v35 = vld [vmem:[#allocation8 + $0x174] ss:$8 sps:$4 sm:$0xff]  }
 0x15d   :  { %2091 = vmatpush1.bf16.msra.mxu0 %v5269_v36  ;;  %v5314_v36 = vld [vmem:[#allocation8 + $0x170] ss:$8 sps:$4 sm:$0xff]  }
 0x15e   :  { %2092 = vmatprep.subr.bf16.mxu0 %v5274_v37  ;;  %v5319_v37 = vld [vmem:[#allocation8 + $0x184] ss:$8 sps:$4 sm:$0xff]  }
 0x161   :  { %2093 = vmatpush1.bf16.msra.mxu0 %v5272_v38  ;;  %v5317_v38 = vld [vmem:[#allocation8 + $0x180] ss:$8 sps:$4 sm:$0xff]  }
 0x162   :  { %2094 = vmatprep.subr.bf16.mxu0 %v5277_v39  ;;  %v5322_v39 = vld [vmem:[#allocation8 + $0x194] ss:$8 sps:$4 sm:$0xff]  }
 0x165   :  { %2095 = vmatpush1.bf16.msra.mxu0 %v5275_v40  ;;  %v5320_v40 = vld [vmem:[#allocation8 + $0x190] ss:$8 sps:$4 sm:$0xff]  }
 0x166   :  { %2096 = vmatprep.subr.bf16.mxu0 %v5280_v41  ;;  %v5325_v41 = vld [vmem:[#allocation8 + $0x1a4] ss:$8 sps:$4 sm:$0xff]  }
 0x169   :  { %2097 = vmatpush1.bf16.msra.mxu0 %v5278_v42  ;;  %v5323_v42 = vld [vmem:[#allocation8 + $0x1a0] ss:$8 sps:$4 sm:$0xff]  }
 0x16a   :  { %2098 = vmatprep.subr.bf16.mxu0 %v5283_v43  ;;  %v5328_v43 = vld [vmem:[#allocation8 + $0x1b4] ss:$8 sps:$4 sm:$0xff]  }
 0x16d   :  { %2099 = vmatpush1.bf16.msra.mxu0 %v5281_v44  ;;  %v5326_v44 = vld [vmem:[#allocation8 + $0x1b0] ss:$8 sps:$4 sm:$0xff]  }
 0x16e   :  { %2100 = vmatprep.subr.bf16.mxu0 %v5286_v45  ;;  %v5331_v45 = vld [vmem:[#allocation8 + $0x1c4] ss:$8 sps:$4 sm:$0xff]  }
 0x171   :  { %2101 = vmatpush1.bf16.msra.mxu0 %v5284_v46  ;;  %v6095_v46 = vsub.s32 2, %v6070_v57 }
 0x172   :  { %2102 = vmatprep.subr.bf16.mxu0 %v5289_v47  ;;  %v5329_v47 = vld [vmem:[#allocation8 + $0x1c0] ss:$8 sps:$4 sm:$0xff]  }
 0x175   :  { %2103 = vmatpush1.bf16.msra.mxu0 %v5287_v48  ;;  %v5334_v48 = vld [vmem:[#allocation8 + $0x1d4] ss:$8 sps:$4 sm:$0xff]  }
 0x176   :  { %2104 = vmatprep.subr.bf16.mxu0 %v5292_v49  ;;  %v341_v49 = vrot.slane %v6078_v59, %v6095_v46  ;;  %v5349_v59 = vld [vmem:[#allocation10 + $0x44] ss:$16 sps:$4 sm:$0xff]  }
 0x177   :  { %2384 = vmatprep.subr.bf16.mxu1 %v5349_v59 }
 0x179   :  { %2105 = vmatpush1.bf16.msra.mxu0 %v5290_v50  ;;  %v5332_v50 = vld [vmem:[#allocation8 + $0x1d0] ss:$8 sps:$4 sm:$0xff]  }
 0x17a   :  { %2115 = vmatprep.subr.bf16.mxu0 %v5295_v51  ;;  %v5337_v51 = vld [vmem:[#allocation8 + $0x1e4] ss:$8 sps:$4 sm:$0xff]  }
 0x20f   :  { %v1491_v1 = vpop.f32.mrb[0].mxu0  ;;  %v6092_v2 = vpop.f32.mrb[0].mxu1 }
 0x210   :  { %v4884_v3 = vadd.f32 %v1491_v1, %v333_v62  ;;  %v1493_v4 = vpop.f32.mrb[1].mxu0  ;;  %v1657_v5 = vpop.f32.mrb[1].mxu1  ;;  %v4886_v52 = vadd.f32 %v6092_v2, %v341_v49  ;;  %v5352_v1 = vld [vmem:[#allocation10 + $0x64] ss:$16 sps:$4 sm:$0xff]  }
 0x211   :  { %v4885_v6 = vadd.f32 %v1493_v4, %v337_v63  ;;  %v4887_v7 = vadd.f32 %v1657_v5, %v345_v0  ;;  %v1495_v8 = vpop.f32.mrb[2].mxu0  ;;  %v1659_v9 = vpop.f32.mrb[2].mxu1  ;;  %v5347_v0 = vld [vmem:[#allocation10 + $0x40] ss:$16 sps:$4 sm:$0xff]   ;;  %v5355_v2 = vld [vmem:[#allocation10 + $0x84] ss:$16 sps:$4 sm:$0xff]  }
 0x212   :  { %vm1662_vm1 = vcmp.gt.f32.partialorder %v4884_v3, 0.0  ;;  %v1666_v10 = vmul.f32 0.2, %v4884_v3  ;;  %v1496_v14 = vpop.f32.mrb[3].mxu0  ;;  %v1660_v15 = vpop.f32.mrb[3].mxu1  ;;  %vm1664_vm4 = vcmp.gt.f32.partialorder %v4886_v52, 0.0  ;;  %2385 = vmatpush1.bf16.msra.mxu1 %v5347_v0 }
 0x213   :  { %vm1663_vm2 = vcmp.gt.f32.partialorder %v4885_v6, 0.0  ;;  %v1667_v11 = vmul.f32 0.2, %v4885_v6  ;;  %vm1665_vm3 = vcmp.gt.f32.partialorder %v4887_v7, 0.0  ;;  %v1669_v12 = vmul.f32 0.2, %v4887_v7  ;;  %2386 = vmatprep.subr.bf16.mxu1 %v5352_v1 }
 0x214   :  { %v1670_v13 = vsel %vm1662_vm1, %v4884_v3, %v1666_v10  ;;  %v1668_v55 = vmul.f32 0.2, %v4886_v52  ;;  %v5350_v3 = vld [vmem:[#allocation10 + $0x60] ss:$16 sps:$4 sm:$0xff]   ;;  %v5358_v5 = vld [vmem:[#allocation10 + $0xa4] ss:$16 sps:$4 sm:$0xff]  }
 0x215   :  { %v1671_v16 = vsel %vm1663_vm2, %v4885_v6, %v1667_v11  ;;  %v1673_v18 = vsel %vm1665_vm3, %v4887_v7, %v1669_v12  ;;  %v1674_v21 = vpack.c.bf16 %v1670_v13, %v1670_v13  ;;  %v5353_v4 = vld [vmem:[#allocation10 + $0x80] ss:$16 sps:$4 sm:$0xff]   ;;  %v5361_v7 = vld [vmem:[#allocation10 + $0xc4] ss:$16 sps:$4 sm:$0xff]   ;;  %v5367_v11 = vld [vmem:[#allocation10 + $0xc] ss:$16 sps:$4 sm:$0xff]  }
 0x216   :  { %v1675_v19 = vpack.c.bf16 %v1671_v16, %v1671_v16  ;;  %v1677_v23 = vpack.c.bf16 %v1673_v18, %v1673_v18  ;;  %v1672_v62 = vsel %vm1664_vm4, %v4886_v52, %v1668_v55  ;;  %2387 = vmatpush1.bf16.msra.mxu1 %v5350_v3  ;;  %v5356_v6 = vld [vmem:[#allocation10 + $0xa0] ss:$16 sps:$4 sm:$0xff]   ;;  %v5364_v9 = vld [vmem:[#allocation10 + $0xe4] ss:$16 sps:$4 sm:$0xff]   ;;  %v5394_v13 = vld [vmem:[#allocation11 + $0xc] ss:$28 sps:$4 sm:$0xff]  }
 0x217   :  { %v1676_v63 = vpack.c.bf16 %v1672_v62, %v1672_v62  ;;  %2388 = vmatprep.subr.bf16.mxu1 %v5355_v2  ;;  %v5359_v8 = vld [vmem:[#allocation10 + $0xc0] ss:$16 sps:$4 sm:$0xff]   ;;  %v5392_v12 = vld [vmem:[#allocation11 + $0x8] ss:$28 sps:$4 sm:$0xff]   ;;  %v5406_v16 = vld [vmem:[#allocation11 + $0x7c] ss:$28 sps:$4 sm:$0xff]  }
 0x218   :  { %2106 = vmatprep.mubr.bf16.mxu0 %v1675_v19  ;;  %v5362_v10 = vld [vmem:[#allocation10 + $0xe0] ss:$16 sps:$4 sm:$0xff]   ;;  %v5404_v18 = vld [vmem:[#allocation11 + $0x78] ss:$28 sps:$4 sm:$0xff]   ;;  %v5370_v0 = vld [vmem:[#allocation10 + $0x2c] ss:$16 sps:$4 sm:$0xff]  }
 0x219   :  { %2107 = vmatmul.mubr.bf16.vlgmr.msra.gmra.mrb[4].mxu0 %v1674_v21  ;;  %v5400_v14 = vld [vmem:[#allocation11 + $0x44] ss:$28 sps:$4 sm:$0xff]   ;;  %v5412_v19 = vld [vmem:[#allocation11 + $0xb4] ss:$28 sps:$4 sm:$0xff]   ;;  %v5418_v21 = vld [vmem:[#allocation11 + $0xec] ss:$28 sps:$4 sm:$0xff]  }
 0x21a   :  { %2116 = vmatpush1.bf16.msra.mxu0 %v5293_v20  ;;  %2147 = vmatprep.mubr.bf16.mxu0 %v1677_v23  ;;  %v5398_v15 = vld [vmem:[#allocation11 + $0x40] ss:$28 sps:$4 sm:$0xff]   ;;  %v5410_v20 = vld [vmem:[#allocation11 + $0xb0] ss:$28 sps:$4 sm:$0xff]   ;;  %v5368_v1 = vld [vmem:[#allocation10 + $0x28] ss:$16 sps:$4 sm:$0xff]  }
 0x21b   :  { %2117 = vmatprep.subr.bf16.mxu0 %v5298_v22  ;;  %2389 = vmatpush1.bf16.msra.mxu1 %v5353_v4  ;;  %v5416_v22 = vld [vmem:[#allocation11 + $0xe8] ss:$28 sps:$4 sm:$0xff]   ;;  %v5373_v3 = vld [vmem:[#allocation10 + $0x4c] ss:$16 sps:$4 sm:$0xff]  }
 0x21c   :  { %2390 = vmatprep.subr.bf16.mxu1 %v5358_v5  ;;  %v5424_v23 = vld [vmem:[#allocation11 + $0x124] ss:$28 sps:$4 sm:$0xff]   ;;  %v5371_v2 = vld [vmem:[#allocation10 + $0x48] ss:$16 sps:$4 sm:$0xff]   ;;  %v5376_v4 = vld [vmem:[#allocation10 + $0x6c] ss:$16 sps:$4 sm:$0xff]  }
 0x21d   :  { %v5374_v5 = vld [vmem:[#allocation10 + $0x68] ss:$16 sps:$4 sm:$0xff]  }
 0x21e   :  { %2118 = vmatpush1.bf16.msra.mxu0 %v5296_v24  ;;  %v5422_v24 = vld [vmem:[#allocation11 + $0x120] ss:$28 sps:$4 sm:$0xff]  }
 0x21f   :  { %2119 = vmatprep.subr.bf16.mxu0 %v5301_v25  ;;  %2391 = vmatpush1.bf16.msra.mxu1 %v5356_v6  ;;  %v5430_v25 = vld [vmem:[#allocation11 + $0x15c] ss:$28 sps:$4 sm:$0xff]  }
 0x220   :  { %2392 = vmatprep.subr.bf16.mxu1 %v5361_v7  ;;  %v5379_v6 = vld [vmem:[#allocation10 + $0x8c] ss:$16 sps:$4 sm:$0xff]   ;;  %v5377_v7 = vld [vmem:[#allocation10 + $0x88] ss:$16 sps:$4 sm:$0xff]  }
 0x222   :  { %2120 = vmatpush1.bf16.msra.mxu0 %v5299_v26  ;;  %v5428_v26 = vld [vmem:[#allocation11 + $0x158] ss:$28 sps:$4 sm:$0xff]  }
 0x223   :  { %2121 = vmatprep.subr.bf16.mxu0 %v5304_v27  ;;  %2393 = vmatpush1.bf16.msra.mxu1 %v5359_v8  ;;  %v5436_v27 = vld [vmem:[#allocation11 + $0x194] ss:$28 sps:$4 sm:$0xff]   ;;  %v5382_v8 = vld [vmem:[#allocation10 + $0xac] ss:$16 sps:$4 sm:$0xff]  }
 0x224   :  { %2394 = vmatprep.subr.bf16.mxu1 %v5364_v9  ;;  %v5380_v9 = vld [vmem:[#allocation10 + $0xa8] ss:$16 sps:$4 sm:$0xff]  }
 0x226   :  { %2122 = vmatpush1.bf16.msra.mxu0 %v5302_v28  ;;  %v5434_v28 = vld [vmem:[#allocation11 + $0x190] ss:$28 sps:$4 sm:$0xff]  }
 0x227   :  { %2123 = vmatprep.subr.bf16.mxu0 %v5307_v29  ;;  %2395 = vmatpush1.bf16.msra.mxu1 %v5362_v10  ;;  %v5442_v29 = vld [vmem:[#allocation11 + $0x1cc] ss:$28 sps:$4 sm:$0xff]  }
 0x228   :  { %2421 = vmatprep.subr.bf16.mxu1 %v5367_v11  ;;  %v5385_v10 = vld [vmem:[#allocation10 + $0xcc] ss:$16 sps:$4 sm:$0xff]  }
 0x229   :  { %v5388_v11 = vld [vmem:[#allocation10 + $0xec] ss:$16 sps:$4 sm:$0xff]  }
 0x22a   :  { %2124 = vmatpush1.bf16.msra.mxu0 %v5305_v30  ;;  %v5440_v30 = vld [vmem:[#allocation11 + $0x1c8] ss:$28 sps:$4 sm:$0xff]  }
 0x22b   :  { %2125 = vmatprep.subr.bf16.mxu0 %v5310_v31  ;;  %v5448_v31 = vld [vmem:[#allocation11 + $0x204] ss:$28 sps:$4 sm:$0xff]  }
 0x22e   :  { %2126 = vmatpush1.bf16.msra.mxu0 %v5308_v32  ;;  %v5446_v32 = vld [vmem:[#allocation11 + $0x200] ss:$28 sps:$4 sm:$0xff]  }
 0x22f   :  { %2127 = vmatprep.subr.bf16.mxu0 %v5313_v33  ;;  %v5454_v33 = vld [vmem:[#allocation11 + $0x23c] ss:$28 sps:$4 sm:$0xff]  }
 0x232   :  { %2128 = vmatpush1.bf16.msra.mxu0 %v5311_v34  ;;  %v5452_v34 = vld [vmem:[#allocation11 + $0x238] ss:$28 sps:$4 sm:$0xff]  }
 0x233   :  { %2129 = vmatprep.subr.bf16.mxu0 %v5316_v35  ;;  %v5460_v35 = vld [vmem:[#allocation11 + $0x274] ss:$28 sps:$4 sm:$0xff]  }
 0x236   :  { %2130 = vmatpush1.bf16.msra.mxu0 %v5314_v36  ;;  %v5458_v36 = vld [vmem:[#allocation11 + $0x270] ss:$28 sps:$4 sm:$0xff]  }
 0x237   :  { %2131 = vmatprep.subr.bf16.mxu0 %v5319_v37  ;;  %v5466_v37 = vld [vmem:[#allocation11 + $0x2ac] ss:$28 sps:$4 sm:$0xff]  }
 0x23a   :  { %2132 = vmatpush1.bf16.msra.mxu0 %v5317_v38  ;;  %v5464_v38 = vld [vmem:[#allocation11 + $0x2a8] ss:$28 sps:$4 sm:$0xff]  }
 0x23b   :  { %2133 = vmatprep.subr.bf16.mxu0 %v5322_v39  ;;  %v5472_v39 = vld [vmem:[#allocation11 + $0x2e4] ss:$28 sps:$4 sm:$0xff]  }
 0x23e   :  { %2134 = vmatpush1.bf16.msra.mxu0 %v5320_v40  ;;  %v5470_v40 = vld [vmem:[#allocation11 + $0x2e0] ss:$28 sps:$4 sm:$0xff]  }
 0x23f   :  { %2135 = vmatprep.subr.bf16.mxu0 %v5325_v41  ;;  %v1742_v41 = vld [vmem:[%s6185_s5] sm:$0x3] }
 0x242   :  { %2136 = vmatpush1.bf16.msra.mxu0 %v5323_v42  ;;  %v1747_v42 = vrot.slane %v1742_v41, %v6073_v58 }
 0x243   :  { %2137 = vmatprep.subr.bf16.mxu0 %v5328_v43  ;;  %v1751_v43 = vrot.slane %v1742_v41, %v6081_v60  ;;  %v5467_v41 = vld [vmem:[#allocation11 + $0x2d8] ss:$28 sps:$4 sm:$0xff]  }
 0x246   :  { %2138 = vmatpush1.bf16.msra.mxu0 %v5326_v44 }
 0x247   :  { %2139 = vmatprep.subr.bf16.mxu0 %v5331_v45 }
 0x24a   :  { %2140 = vmatpush1.bf16.msra.mxu0 %v5329_v47 }
 0x24b   :  { %2141 = vmatprep.subr.bf16.mxu0 %v5334_v48 }
 0x24e   :  { %2142 = vmatpush1.bf16.msra.mxu0 %v5332_v50 }
 0x24f   :  { %2143 = vmatprep.subr.bf16.mxu0 %v5337_v51 }
 0x252   :  { %2144 = vmatpush1.bf16.msra.mxu0 %v5335_v53  ;;  %v2161_v53 = vld [vmem:[#allocation5] sm:$0xf] }
 0x253   :  { %2145 = vmatprep.subr.bf16.mxu0 %v5340_v54  ;;  %v2162_v54 = vunpack.c.l.bf16 %v2161_v53  ;;  %v6109_v53 = vld [vmem:[%s6187_s7] sm:$0xf] }
 0x256   :  { %2146 = vmatpush1.bf16.msra.mxu0 %v5338_v56 }
 0x257   :  { %4005 = vmatprep.subr.bf16.mxu0 %v5394_v13  ;;  %v5391_v13 = vld [vmem:[#allocation11 + $0x4] ss:$28 sps:$4 sm:$0xff]  }
 0x259   :  { %2148 = vmatmul.mubr.bf16.vlgmr.msra.gmra.mrb[4].mxu0 %v1676_v63  ;;  %v5365_v63 = vld [vmem:[#allocation10 + $0x8] ss:$16 sps:$4 sm:$0xff]  }
 0x25a   :  { %4006 = vmatpush1.bf16.msra.mxu0 %v5392_v12  ;;  %v5386_v12 = vld [vmem:[#allocation10 + $0xe8] ss:$16 sps:$4 sm:$0xff]  }
 0x25b   :  { %4007 = vmatprep.subr.bf16.mxu0 %v5400_v14  ;;  %v5389_v14 = vld [vmem:[#allocation11] ss:$28 sps:$4 sm:$0xff]  }
 0x25e   :  { %4008 = vmatpush1.bf16.msra.mxu0 %v5398_v15  ;;  %v5397_v15 = vld [vmem:[#allocation11 + $0x3c] ss:$28 sps:$4 sm:$0xff]  }
 0x25f   :  { %4009 = vmatprep.subr.bf16.mxu0 %v5406_v16  ;;  %v5395_v16 = vld [vmem:[#allocation11 + $0x38] ss:$28 sps:$4 sm:$0xff]  }
 0x262   :  { %4010 = vmatpush1.bf16.msra.mxu0 %v5404_v18  ;;  %v5403_v18 = vld [vmem:[#allocation11 + $0x74] ss:$28 sps:$4 sm:$0xff]  }
 0x263   :  { %4011 = vmatprep.subr.bf16.mxu0 %v5412_v19  ;;  %v5401_v19 = vld [vmem:[#allocation11 + $0x70] ss:$28 sps:$4 sm:$0xff]  }
 0x266   :  { %4012 = vmatpush1.bf16.msra.mxu0 %v5410_v20  ;;  %v5409_v20 = vld [vmem:[#allocation11 + $0xac] ss:$28 sps:$4 sm:$0xff]  }
 0x267   :  { %4013 = vmatprep.subr.bf16.mxu0 %v5418_v21  ;;  %v5407_v21 = vld [vmem:[#allocation11 + $0xa8] ss:$28 sps:$4 sm:$0xff]  }
 0x26a   :  { %4014 = vmatpush1.bf16.msra.mxu0 %v5416_v22  ;;  %v5415_v22 = vld [vmem:[#allocation11 + $0xe4] ss:$28 sps:$4 sm:$0xff]  }
 0x26b   :  { %4015 = vmatprep.subr.bf16.mxu0 %v5424_v23  ;;  %v5413_v23 = vld [vmem:[#allocation11 + $0xe0] ss:$28 sps:$4 sm:$0xff]  }
 0x26e   :  { %4016 = vmatpush1.bf16.msra.mxu0 %v5422_v24  ;;  %v5421_v24 = vld [vmem:[#allocation11 + $0x11c] ss:$28 sps:$4 sm:$0xff]  }
 0x26f   :  { %4017 = vmatprep.subr.bf16.mxu0 %v5430_v25  ;;  %v5419_v25 = vld [vmem:[#allocation11 + $0x118] ss:$28 sps:$4 sm:$0xff]  }
 0x272   :  { %4018 = vmatpush1.bf16.msra.mxu0 %v5428_v26  ;;  %v5427_v26 = vld [vmem:[#allocation11 + $0x154] ss:$28 sps:$4 sm:$0xff]  }
 0x273   :  { %4019 = vmatprep.subr.bf16.mxu0 %v5436_v27  ;;  %v5425_v27 = vld [vmem:[#allocation11 + $0x150] ss:$28 sps:$4 sm:$0xff]  }
 0x276   :  { %4020 = vmatpush1.bf16.msra.mxu0 %v5434_v28  ;;  %v5433_v28 = vld [vmem:[#allocation11 + $0x18c] ss:$28 sps:$4 sm:$0xff]  }
 0x277   :  { %4021 = vmatprep.subr.bf16.mxu0 %v5442_v29  ;;  %v5431_v29 = vld [vmem:[#allocation11 + $0x188] ss:$28 sps:$4 sm:$0xff]  }
 0x27a   :  { %4022 = vmatpush1.bf16.msra.mxu0 %v5440_v30  ;;  %v5439_v30 = vld [vmem:[#allocation11 + $0x1c4] ss:$28 sps:$4 sm:$0xff]  }
 0x27b   :  { %4023 = vmatprep.subr.bf16.mxu0 %v5448_v31  ;;  %v5437_v31 = vld [vmem:[#allocation11 + $0x1c0] ss:$28 sps:$4 sm:$0xff]  }
 0x27e   :  { %4024 = vmatpush1.bf16.msra.mxu0 %v5446_v32  ;;  %v5445_v32 = vld [vmem:[#allocation11 + $0x1fc] ss:$28 sps:$4 sm:$0xff]  }
 0x27f   :  { %4025 = vmatprep.subr.bf16.mxu0 %v5454_v33  ;;  %v5443_v33 = vld [vmem:[#allocation11 + $0x1f8] ss:$28 sps:$4 sm:$0xff]  }
 0x282   :  { %4026 = vmatpush1.bf16.msra.mxu0 %v5452_v34  ;;  %v5451_v34 = vld [vmem:[#allocation11 + $0x234] ss:$28 sps:$4 sm:$0xff]  }
 0x283   :  { %4027 = vmatprep.subr.bf16.mxu0 %v5460_v35  ;;  %v5449_v35 = vld [vmem:[#allocation11 + $0x230] ss:$28 sps:$4 sm:$0xff]  }
 0x286   :  { %4028 = vmatpush1.bf16.msra.mxu0 %v5458_v36  ;;  %v5457_v36 = vld [vmem:[#allocation11 + $0x26c] ss:$28 sps:$4 sm:$0xff]  }
 0x287   :  { %4029 = vmatprep.subr.bf16.mxu0 %v5466_v37  ;;  %v5455_v37 = vld [vmem:[#allocation11 + $0x268] ss:$28 sps:$4 sm:$0xff]  }
 0x28a   :  { %4030 = vmatpush1.bf16.msra.mxu0 %v5464_v38  ;;  %v5463_v38 = vld [vmem:[#allocation11 + $0x2a4] ss:$28 sps:$4 sm:$0xff]  }
 0x28b   :  { %4031 = vmatprep.subr.bf16.mxu0 %v5472_v39  ;;  %v5461_v39 = vld [vmem:[#allocation11 + $0x2a0] ss:$28 sps:$4 sm:$0xff]  }
 0x28e   :  { %4032 = vmatpush1.bf16.msra.mxu0 %v5470_v40  ;;  %v5469_v40 = vld [vmem:[#allocation11 + $0x2dc] ss:$28 sps:$4 sm:$0xff]  }
 0x32c   :  { %v2149_v44 = vpop.f32.mrb[4].mxu0 }
 0x32d   :  { %v4888_v45 = vadd.f32 %v2149_v44, %v1747_v42  ;;  %v2151_v47 = vpop.f32.mrb[5].mxu0  ;;  %v5475_v42 = vld [vmem:[#allocation11 + $0x314] ss:$28 sps:$4 sm:$0xff]  }
 0x32e   :  { %v4889_v48 = vadd.f32 %v2151_v47, %v1751_v43  ;;  %v2153_v49 = vpop.f32.mrb[6].mxu0  ;;  %v5478_v43 = vld [vmem:[#allocation11 + $0x31c] ss:$28 sps:$4 sm:$0xff]   ;;  %v5481_v47 = vld [vmem:[#allocation11 + $0x34c] ss:$28 sps:$4 sm:$0xff]  }
 0x32f   :  { %2156 = vst [vmem:[#allocation14] sm:$0xff] %v4888_v45  ;;  %v2154_v50 = vpop.f32.mrb[7].mxu0  ;;  %v5476_v44 = vld [vmem:[#allocation11 + $0x318] ss:$28 sps:$4 sm:$0xff]   ;;  %4033 = vmatprep.subr.bf16.mxu0 %v5478_v43  ;;  %v5482_v49 = vld [vmem:[#allocation11 + $0x350] ss:$28 sps:$4 sm:$0xff]  }
 0x330   :  { %2157 = vst [vmem:[#allocation14 + $0x8] sm:$0xff] %v4889_v48  ;;  %v2158_v51 = vmul.f32 0.5, %v4889_v48  ;;  %4034 = vmatpush1.bf16.msra.mxu0 %v5476_v44  ;;  %v5484_v48 = vld [vmem:[#allocation11 + $0x354] ss:$28 sps:$4 sm:$0xff]   ;;  %v5479_v50 = vld [vmem:[#allocation11 + $0x348] ss:$28 sps:$4 sm:$0xff]  }
 0x331   :  { %4035 = vmatprep.subr.bf16.mxu0 %v5484_v48  ;;  %v5530_v43 = vld [vmem:[#allocation11 + $0x510] ss:$28 sps:$4 sm:$0xff]   ;;  %v5535_v44 = vld [vmem:[#allocation11 + $0x544] ss:$28 sps:$4 sm:$0xff]  }
 0x332   :  { %v2159_v52 = vmul.f32 1.442695, %v2158_v51  ;;  %v5487_v51 = vld [vmem:[#allocation11 + $0x384] ss:$28 sps:$4 sm:$0xff]  }
 0x334   :  { %5709 = vpow2.f32 %v2159_v52  ;;  %4036 = vmatpush1.bf16.msra.mxu0 %v5482_v49  ;;  %v5490_v52 = vld [vmem:[#allocation11 + $0x38c] ss:$28 sps:$4 sm:$0xff]  }
 0x335   :  { %4046 = vmatprep.subr.bf16.mxu0 %v5490_v52  ;;  %v5541_v52 = vld [vmem:[#allocation11 + $0x57c] ss:$28 sps:$4 sm:$0xff]  }
 0x33e   :  { %v5710_v55 = vpop.eup %5709 }
 0x33f   :  { %v2163_v56 = vmul.f32 %v5710_v55, %v2162_v54  ;;  %v2203_v54 = vrot.slane %v6109_v53, %v6073_v58  ;;  %v2207_v55 = vrot.slane %v6109_v53, %v6081_v60 }
 0x341   :  { %v2164_v62 = vadd.f32 %v4888_v45, %v2163_v56  ;;  %v5473_v45 = vld [vmem:[#allocation11 + $0x310] ss:$28 sps:$4 sm:$0xff]  }
 0x343   :  { %v2165_v59 = vpack.c.bf16 %v2164_v62, %v2164_v62 }
 0x345   :  { %2413 = vmatmul.mubr.bf16.vlgmr.msra.gmra.mrb[4].mxu1 %v2165_v59 }
 0x346   :  { %2422 = vmatpush1.bf16.msra.mxu1 %v5365_v63  ;;  %2453 = vmatprep.mubr.bf16.mxu1 %v5911_v17  ;;  %v5383_v17 = vld [vmem:[#allocation10 + $0xc8] ss:$16 sps:$4 sm:$0xff]  }
 0x347   :  { %2423 = vmatprep.subr.bf16.mxu1 %v5370_v0 }
 0x34a   :  { %2424 = vmatpush1.bf16.msra.mxu1 %v5368_v1 }
 0x34b   :  { %2425 = vmatprep.subr.bf16.mxu1 %v5373_v3 }
 0x34e   :  { %2426 = vmatpush1.bf16.msra.mxu1 %v5371_v2 }
 0x34f   :  { %2427 = vmatprep.subr.bf16.mxu1 %v5376_v4 }
 0x352   :  { %2428 = vmatpush1.bf16.msra.mxu1 %v5374_v5 }
 0x353   :  { %2429 = vmatprep.subr.bf16.mxu1 %v5379_v6 }
 0x356   :  { %2430 = vmatpush1.bf16.msra.mxu1 %v5377_v7  ;;  %v5485_v7 = vld [vmem:[#allocation11 + $0x380] ss:$28 sps:$4 sm:$0xff]  }
 0x357   :  { %2431 = vmatprep.subr.bf16.mxu1 %v5382_v8  ;;  %v5488_v8 = vld [vmem:[#allocation11 + $0x388] ss:$28 sps:$4 sm:$0xff]  }
 0x35a   :  { %2432 = vmatpush1.bf16.msra.mxu1 %v5380_v9 }
 0x35b   :  { %2433 = vmatprep.subr.bf16.mxu1 %v5385_v10  ;;  %v5493_v10 = vld [vmem:[#allocation11 + $0x3bc] ss:$28 sps:$4 sm:$0xff]  }
 0x35e   :  { %2434 = vmatpush1.bf16.msra.mxu1 %v5383_v17  ;;  %v5496_v17 = vld [vmem:[#allocation11 + $0x3c4] ss:$28 sps:$4 sm:$0xff]  }
 0x35f   :  { %2435 = vmatprep.subr.bf16.mxu1 %v5388_v11  ;;  %v5491_v11 = vld [vmem:[#allocation11 + $0x3b8] ss:$28 sps:$4 sm:$0xff]  }
 0x362   :  { %2436 = vmatpush1.bf16.msra.mxu1 %v5386_v12  ;;  %v5494_v12 = vld [vmem:[#allocation11 + $0x3c0] ss:$28 sps:$4 sm:$0xff]  }
 0x363   :  { %3923 = vmatprep.subr.bf16.mxu1 %v5391_v13  ;;  %v5499_v13 = vld [vmem:[#allocation11 + $0x3f4] ss:$28 sps:$4 sm:$0xff]  }
 0x365   :  { %2454 = vmatmul.mubr.bf16.vlgmr.msra.gmra.mrb[8].mxu1 %v2165_v59 }
 0x366   :  { %3924 = vmatpush1.bf16.msra.mxu1 %v5389_v14  ;;  %v5502_v14 = vld [vmem:[#allocation11 + $0x3fc] ss:$28 sps:$4 sm:$0xff]  }
 0x367   :  { %3925 = vmatprep.subr.bf16.mxu1 %v5397_v15  ;;  %v5497_v15 = vld [vmem:[#allocation11 + $0x3f0] ss:$28 sps:$4 sm:$0xff]  }
 0x36a   :  { %3926 = vmatpush1.bf16.msra.mxu1 %v5395_v16  ;;  %v5500_v16 = vld [vmem:[#allocation11 + $0x3f8] ss:$28 sps:$4 sm:$0xff]  }
 0x36b   :  { %3927 = vmatprep.subr.bf16.mxu1 %v5403_v18  ;;  %v5505_v18 = vld [vmem:[#allocation11 + $0x42c] ss:$28 sps:$4 sm:$0xff]  }
 0x36e   :  { %3928 = vmatpush1.bf16.msra.mxu1 %v5401_v19  ;;  %v5508_v19 = vld [vmem:[#allocation11 + $0x434] ss:$28 sps:$4 sm:$0xff]  }
 0x36f   :  { %3929 = vmatprep.subr.bf16.mxu1 %v5409_v20  ;;  %v5503_v20 = vld [vmem:[#allocation11 + $0x428] ss:$28 sps:$4 sm:$0xff]  }
 0x372   :  { %3930 = vmatpush1.bf16.msra.mxu1 %v5407_v21  ;;  %v5506_v21 = vld [vmem:[#allocation11 + $0x430] ss:$28 sps:$4 sm:$0xff]  }
 0x373   :  { %3931 = vmatprep.subr.bf16.mxu1 %v5415_v22  ;;  %v5511_v22 = vld [vmem:[#allocation11 + $0x464] ss:$28 sps:$4 sm:$0xff]  }
 0x376   :  { %3932 = vmatpush1.bf16.msra.mxu1 %v5413_v23  ;;  %v5514_v23 = vld [vmem:[#allocation11 + $0x46c] ss:$28 sps:$4 sm:$0xff]  }
 0x377   :  { %3933 = vmatprep.subr.bf16.mxu1 %v5421_v24  ;;  %v5509_v24 = vld [vmem:[#allocation11 + $0x460] ss:$28 sps:$4 sm:$0xff]  }
 0x37a   :  { %3934 = vmatpush1.bf16.msra.mxu1 %v5419_v25  ;;  %v5512_v25 = vld [vmem:[#allocation11 + $0x468] ss:$28 sps:$4 sm:$0xff]  }
 0x37b   :  { %3935 = vmatprep.subr.bf16.mxu1 %v5427_v26  ;;  %v5517_v26 = vld [vmem:[#allocation11 + $0x49c] ss:$28 sps:$4 sm:$0xff]  }
 0x37e   :  { %3936 = vmatpush1.bf16.msra.mxu1 %v5425_v27  ;;  %v5520_v27 = vld [vmem:[#allocation11 + $0x4a4] ss:$28 sps:$4 sm:$0xff]  }
 0x37f   :  { %3937 = vmatprep.subr.bf16.mxu1 %v5433_v28  ;;  %v5515_v28 = vld [vmem:[#allocation11 + $0x498] ss:$28 sps:$4 sm:$0xff]  }
 0x382   :  { %3938 = vmatpush1.bf16.msra.mxu1 %v5431_v29  ;;  %v5518_v29 = vld [vmem:[#allocation11 + $0x4a0] ss:$28 sps:$4 sm:$0xff]  }
 0x383   :  { %3939 = vmatprep.subr.bf16.mxu1 %v5439_v30  ;;  %v5523_v30 = vld [vmem:[#allocation11 + $0x4d4] ss:$28 sps:$4 sm:$0xff]  }
 0x386   :  { %3940 = vmatpush1.bf16.msra.mxu1 %v5437_v31  ;;  %v5526_v31 = vld [vmem:[#allocation11 + $0x4dc] ss:$28 sps:$4 sm:$0xff]  }
 0x387   :  { %3941 = vmatprep.subr.bf16.mxu1 %v5445_v32  ;;  %v2215_v32 = vrot.slane %v6109_v53, %v6084_v61 }
 0x38a   :  { %3942 = vmatpush1.bf16.msra.mxu1 %v5443_v33  ;;  %v5521_v33 = vld [vmem:[#allocation11 + $0x4d0] ss:$28 sps:$4 sm:$0xff]  }
 0x38b   :  { %3943 = vmatprep.subr.bf16.mxu1 %v5451_v34  ;;  %v5524_v34 = vld [vmem:[#allocation11 + $0x4d8] ss:$28 sps:$4 sm:$0xff]  }
 0x38e   :  { %3944 = vmatpush1.bf16.msra.mxu1 %v5449_v35 }
 0x38f   :  { %3945 = vmatprep.subr.bf16.mxu1 %v5457_v36  ;;  %v5529_v36 = vld [vmem:[#allocation11 + $0x50c] ss:$28 sps:$4 sm:$0xff]  }
 0x392   :  { %3946 = vmatpush1.bf16.msra.mxu1 %v5455_v37  ;;  %v5532_v37 = vld [vmem:[#allocation11 + $0x514] ss:$28 sps:$4 sm:$0xff]  }
 0x393   :  { %3947 = vmatprep.subr.bf16.mxu1 %v5463_v38 }
 0x396   :  { %3948 = vmatpush1.bf16.msra.mxu1 %v5461_v39 }
 0x397   :  { %3949 = vmatprep.subr.bf16.mxu1 %v5469_v40 }
 0x39a   :  { %3950 = vmatpush1.bf16.msra.mxu1 %v5467_v41  ;;  %v5527_v41 = vld [vmem:[#allocation11 + $0x508] ss:$28 sps:$4 sm:$0xff]  }
 0x39b   :  { %3951 = vmatprep.subr.bf16.mxu1 %v5475_v42 }
 0x39e   :  { %3952 = vmatpush1.bf16.msra.mxu1 %v5473_v45 }
 0x39f   :  { %3953 = vmatprep.subr.bf16.mxu1 %v5481_v47  ;;  %v5538_v47 = vld [vmem:[#allocation11 + $0x54c] ss:$28 sps:$4 sm:$0xff]  }
 0x3a2   :  { %3954 = vmatpush1.bf16.msra.mxu1 %v5479_v50  ;;  %v5533_v50 = vld [vmem:[#allocation11 + $0x540] ss:$28 sps:$4 sm:$0xff]  }
 0x3a3   :  { %3964 = vmatprep.subr.bf16.mxu1 %v5487_v51  ;;  %v5536_v51 = vld [vmem:[#allocation11 + $0x548] ss:$28 sps:$4 sm:$0xff]  }
 0x418   :  { %v2414_v56 = vpop.f32.mrb[4].mxu1 }
 0x419   :  { %v2415_v62 = vadd.f32 %v2414_v56, %v2203_v54  ;;  %v2416_v63 = vpop.f32.mrb[5].mxu1  ;;  %v5544_v54 = vld [vmem:[#allocation11 + $0x584] ss:$28 sps:$4 sm:$0xff]  }
 0x41a   :  { %v2417_v59 = vadd.f32 %v2416_v63, %v2207_v55  ;;  %v2418_v0 = vpop.f32.mrb[6].mxu1  ;;  %v5539_v55 = vld [vmem:[#allocation11 + $0x578] ss:$28 sps:$4 sm:$0xff]   ;;  %v5542_v56 = vld [vmem:[#allocation11 + $0x580] ss:$28 sps:$4 sm:$0xff]  }
 0x41b   :  { %vm2462_vm5 = vcmp.gt.f32.partialorder %v2415_v62, 0.0  ;;  %v2466_v1 = vmul.f32 0.2, %v2415_v62  ;;  %v2419_v3 = vpop.f32.mrb[7].mxu1  ;;  %v5550_v63 = vld [vmem:[#allocation11 + $0x5bc] ss:$28 sps:$4 sm:$0xff]  }
 0x41c   :  { %vm2463_vm6 = vcmp.gt.f32.partialorder %v2417_v59, 0.0  ;;  %v2467_v2 = vmul.f32 0.2, %v2417_v59  ;;  %v5548_v0 = vld [vmem:[#allocation11 + $0x5b8] ss:$28 sps:$4 sm:$0xff]  }
 0x41d   :  { %v2470_v4 = vsel %vm2462_vm5, %v2415_v62, %v2466_v1  ;;  %v5547_v62 = vld [vmem:[#allocation11 + $0x5b4] ss:$28 sps:$4 sm:$0xff]   ;;  %v5553_v1 = vld [vmem:[#allocation11 + $0x5ec] ss:$28 sps:$4 sm:$0xff]  }
 0x41e   :  { %v2471_v5 = vsel %vm2463_vm6, %v2417_v59, %v2467_v2  ;;  %v6117_v9 = vpack.c.bf16 %v2470_v4, %v2470_v4  ;;  %v5545_v59 = vld [vmem:[#allocation11 + $0x5b0] ss:$28 sps:$4 sm:$0xff]   ;;  %v5551_v2 = vld [vmem:[#allocation11 + $0x5e8] ss:$28 sps:$4 sm:$0xff]  }
 0x41f   :  { %v6115_v6 = vpack.c.bf16 %v2471_v5, %v2471_v5  ;;  %v5556_v3 = vld [vmem:[#allocation11 + $0x5f4] ss:$28 sps:$4 sm:$0xff]   ;;  %v5559_v5 = vld [vmem:[#allocation11 + $0x624] ss:$28 sps:$4 sm:$0xff]  }
 0x420   :  { %v5554_v4 = vld [vmem:[#allocation11 + $0x5f0] ss:$28 sps:$4 sm:$0xff]  }
 0x421   :  { %3955 = vmatprep.mubr.bf16.mxu1 %v6115_v6  ;;  %4037 = vmatprep.mubr.bf16.mxu0 %v6115_v6 }
 0x422   :  { %3956 = vmatmul.mubr.bf16.vlgmr.msra.gmra.mrb[12].mxu1 %v6117_v9  ;;  %4038 = vmatmul.mubr.bf16.vlgmr.msra.gmra.mrb[8].mxu0 %v6117_v9 }
 0x423   :  { %3965 = vmatpush1.bf16.msra.mxu1 %v5485_v7  ;;  %4047 = vmatpush1.bf16.msra.mxu0 %v5488_v8  ;;  %v5562_v7 = vld [vmem:[#allocation11 + $0x62c] ss:$28 sps:$4 sm:$0xff]   ;;  %v5557_v8 = vld [vmem:[#allocation11 + $0x620] ss:$28 sps:$4 sm:$0xff]  }
 0x424   :  { %3966 = vmatprep.subr.bf16.mxu1 %v5493_v10  ;;  %4048 = vmatprep.subr.bf16.mxu0 %v5496_v17  ;;  %v5560_v10 = vld [vmem:[#allocation11 + $0x628] ss:$28 sps:$4 sm:$0xff]   ;;  %v5565_v17 = vld [vmem:[#allocation11 + $0x65c] ss:$28 sps:$4 sm:$0xff]  }
 0x427   :  { %3967 = vmatpush1.bf16.msra.mxu1 %v5491_v11  ;;  %4049 = vmatpush1.bf16.msra.mxu0 %v5494_v12  ;;  %v5568_v11 = vld [vmem:[#allocation11 + $0x664] ss:$28 sps:$4 sm:$0xff]   ;;  %v2211_v12 = vrot.slane %v6109_v53, %v6095_v46 }
 0x428   :  { %3968 = vmatprep.subr.bf16.mxu1 %v5499_v13  ;;  %4050 = vmatprep.subr.bf16.mxu0 %v5502_v14  ;;  %v5563_v13 = vld [vmem:[#allocation11 + $0x658] ss:$28 sps:$4 sm:$0xff]   ;;  %v5566_v14 = vld [vmem:[#allocation11 + $0x660] ss:$28 sps:$4 sm:$0xff]   ;;  %v5575_v53 = vld [vmem:[#allocation11 + $0x6c8] ss:$28 sps:$4 sm:$0xff]  }
 0x42b   :  { %3969 = vmatpush1.bf16.msra.mxu1 %v5497_v15  ;;  %4051 = vmatpush1.bf16.msra.mxu0 %v5500_v16  ;;  %v5571_v15 = vld [vmem:[#allocation11 + $0x694] ss:$28 sps:$4 sm:$0xff]   ;;  %v5574_v16 = vld [vmem:[#allocation11 + $0x69c] ss:$28 sps:$4 sm:$0xff]  }
 0x42c   :  { %3970 = vmatprep.subr.bf16.mxu1 %v5505_v18  ;;  %4052 = vmatprep.subr.bf16.mxu0 %v5508_v19  ;;  %v5569_v19 = vld [vmem:[#allocation11 + $0x690] ss:$28 sps:$4 sm:$0xff]  }
 0x42f   :  { %3971 = vmatpush1.bf16.msra.mxu1 %v5503_v20  ;;  %4053 = vmatpush1.bf16.msra.mxu0 %v5506_v21  ;;  %v5572_v20 = vld [vmem:[#allocation11 + $0x698] ss:$28 sps:$4 sm:$0xff]   ;;  %v5577_v21 = vld [vmem:[#allocation11 + $0x6cc] ss:$28 sps:$4 sm:$0xff]  }
 0x430   :  { %3972 = vmatprep.subr.bf16.mxu1 %v5511_v22  ;;  %4054 = vmatprep.subr.bf16.mxu0 %v5514_v23  ;;  %v5580_v22 = vld [vmem:[#allocation11 + $0x6d4] ss:$28 sps:$4 sm:$0xff]  }
 0x433   :  { %3973 = vmatpush1.bf16.msra.mxu1 %v5509_v24  ;;  %4055 = vmatpush1.bf16.msra.mxu0 %v5512_v25  ;;  %v5578_v24 = vld [vmem:[#allocation11 + $0x6d0] ss:$28 sps:$4 sm:$0xff]  }
 0x434   :  { %3974 = vmatprep.subr.bf16.mxu1 %v5517_v26  ;;  %4056 = vmatprep.subr.bf16.mxu0 %v5520_v27  ;;  %v5583_v25 = vld [vmem:[#allocation11 + $0x14] ss:$28 sps:$4 sm:$0xff]  }
 0x435   :  { %v5584_v26 = vld [vmem:[#allocation11 + $0x1d8] ss:$28 sps:$4 sm:$0xff]  }
 0x437   :  { %3975 = vmatpush1.bf16.msra.mxu1 %v5515_v28  ;;  %4057 = vmatpush1.bf16.msra.mxu0 %v5518_v29  ;;  %v5581_v28 = vld [vmem:[#allocation11 + $0x10] ss:$28 sps:$4 sm:$0xff]  }
 0x438   :  { %v6125_v35 = vpop.f32.mrb[8].mxu1  ;;  %3976 = vmatprep.subr.bf16.mxu1 %v5523_v30  ;;  %4058 = vmatprep.subr.bf16.mxu0 %v5526_v31  ;;  %v5585_v30 = vld [vmem:[#allocation11 + $0x18] ss:$28 sps:$4 sm:$0xff]   ;;  %v5588_v31 = vld [vmem:[#allocation11 + $0x4c] ss:$28 sps:$4 sm:$0xff]  }
 0x439   :  { %v2457_v38 = vpop.f32.mrb[9].mxu1  ;;  %v2456_v18 = vadd.f32 %v6125_v35, %v2211_v12  ;;  %v5593_v35 = vld [vmem:[#allocation11 + $0x84] ss:$28 sps:$4 sm:$0xff]  }
 0x43a   :  { %v2458_v39 = vadd.f32 %v2457_v38, %v2215_v32  ;;  %v2459_v40 = vpop.f32.mrb[10].mxu1  ;;  %v5589_v32 = vld [vmem:[#allocation11 + $0x210] ss:$28 sps:$4 sm:$0xff]   ;;  %v5595_v38 = vld [vmem:[#allocation11 + $0x88] ss:$28 sps:$4 sm:$0xff]  }
 0x43b   :  { %v2460_v42 = vpop.f32.mrb[11].mxu1  ;;  %3977 = vmatpush1.bf16.msra.mxu1 %v5521_v33  ;;  %4059 = vmatpush1.bf16.msra.mxu0 %v5524_v34  ;;  %v2468_v23 = vmul.f32 0.2, %v2456_v18  ;;  %vm2464_vm8 = vcmp.gt.f32.partialorder %v2456_v18, 0.0  ;;  %v5586_v33 = vld [vmem:[#allocation11 + $0x48] ss:$28 sps:$4 sm:$0xff]  }
 0x43c   :  { %vm2465_vm7 = vcmp.gt.f32.partialorder %v2458_v39, 0.0  ;;  %v2469_v45 = vmul.f32 0.2, %v2458_v39  ;;  %3978 = vmatprep.subr.bf16.mxu1 %v5529_v36  ;;  %4060 = vmatprep.subr.bf16.mxu0 %v5532_v37  ;;  %v5590_v34 = vld [vmem:[#allocation11 + $0x50] ss:$28 sps:$4 sm:$0xff]  }
 0x43d   :  { %v2472_v27 = vsel %vm2464_vm8, %v2456_v18, %v2468_v23  ;;  %v5594_v36 = vld [vmem:[#allocation11 + $0x248] ss:$28 sps:$4 sm:$0xff]   ;;  %v5591_v37 = vld [vmem:[#allocation11 + $0x80] ss:$28 sps:$4 sm:$0xff]  }
 0x43e   :  { %v2473_v48 = vsel %vm2465_vm7, %v2458_v39, %v2469_v45  ;;  %v6134_v29 = vpack.c.bf16 %v2472_v27, %v2472_v27  ;;  %v5598_v39 = vld [vmem:[#allocation11 + $0xbc] ss:$28 sps:$4 sm:$0xff]   ;;  %v5648_v23 = vld [vmem:[#allocation11 + $0x2ec] ss:$28 sps:$4 sm:$0xff]  }
 0x43f   :  { %v6127_v49 = vpack.c.bf16 %v2473_v48, %v2473_v48  ;;  %3979 = vmatpush1.bf16.msra.mxu1 %v5527_v41  ;;  %4061 = vmatpush1.bf16.msra.mxu0 %v5530_v43  ;;  %v5599_v40 = vld [vmem:[#allocation11 + $0x280] ss:$28 sps:$4 sm:$0xff]   ;;  %v5596_v41 = vld [vmem:[#allocation11 + $0xb8] ss:$28 sps:$4 sm:$0xff]   ;;  %v5609_v48 = vld [vmem:[#allocation11 + $0x2f0] ss:$28 sps:$4 sm:$0xff]  }
 0x440   :  { %3980 = vmatprep.subr.bf16.mxu1 %v5535_v44  ;;  %4062 = vmatprep.subr.bf16.mxu0 %v5538_v47  ;;  %v5600_v42 = vld [vmem:[#allocation11 + $0xc0] ss:$28 sps:$4 sm:$0xff]   ;;  %v5603_v43 = vld [vmem:[#allocation11 + $0xf4] ss:$28 sps:$4 sm:$0xff]   ;;  %v5608_v47 = vld [vmem:[#allocation11 + $0x12c] ss:$28 sps:$4 sm:$0xff]  }
 0x441   :  { %3996 = vmatprep.mubr.bf16.mxu1 %v6127_v49  ;;  %4078 = vmatprep.mubr.bf16.mxu0 %v6127_v49  ;;  %v5601_v44 = vld [vmem:[#allocation11 + $0xf0] ss:$28 sps:$4 sm:$0xff]   ;;  %v5605_v45 = vld [vmem:[#allocation11 + $0xf8] ss:$28 sps:$4 sm:$0xff]   ;;  %v5631_v12 = vld [vmem:[#allocation11 + $0x240] ss:$28 sps:$4 sm:$0xff]  }
 0x442   :  { %v5640_v18 = vld [vmem:[#allocation11 + $0x440] ss:$28 sps:$4 sm:$0xff]   ;;  %v5654_v27 = vld [vmem:[#allocation11 + $0x6a8] ss:$28 sps:$4 sm:$0xff]  }
 0x443   :  { %3981 = vmatpush1.bf16.msra.mxu1 %v5533_v50  ;;  %4063 = vmatpush1.bf16.msra.mxu0 %v5536_v51  ;;  %v5606_v50 = vld [vmem:[#allocation11 + $0x128] ss:$28 sps:$4 sm:$0xff]   ;;  %v5610_v51 = vld [vmem:[#allocation11 + $0x130] ss:$28 sps:$4 sm:$0xff]  }
 0x444   :  { %3982 = vmatprep.subr.bf16.mxu1 %v5541_v52  ;;  %4064 = vmatprep.subr.bf16.mxu0 %v5544_v54  ;;  %v5613_v52 = vld [vmem:[#allocation11 + $0x164] ss:$28 sps:$4 sm:$0xff]  }
 0x445   :  { %v5614_v54 = vld [vmem:[#allocation11 + $0x328] ss:$28 sps:$4 sm:$0xff]  }
 0x447   :  { %3983 = vmatpush1.bf16.msra.mxu1 %v5539_v55  ;;  %4065 = vmatpush1.bf16.msra.mxu0 %v5542_v56  ;;  %v5611_v55 = vld [vmem:[#allocation11 + $0x160] ss:$28 sps:$4 sm:$0xff]   ;;  %v5615_v56 = vld [vmem:[#allocation11 + $0x168] ss:$28 sps:$4 sm:$0xff]  }
 0x448   :  { %3984 = vmatprep.subr.bf16.mxu1 %v5547_v62  ;;  %4066 = vmatprep.subr.bf16.mxu0 %v5550_v63  ;;  %v5618_v62 = vld [vmem:[#allocation11 + $0x19c] ss:$28 sps:$4 sm:$0xff]  }
 0x449   :  { %v5619_v63 = vld [vmem:[#allocation11 + $0x360] ss:$28 sps:$4 sm:$0xff]  }
 0x44b   :  { %3985 = vmatpush1.bf16.msra.mxu1 %v5545_v59  ;;  %4067 = vmatpush1.bf16.msra.mxu0 %v5548_v0  ;;  %v5616_v59 = vld [vmem:[#allocation11 + $0x198] ss:$28 sps:$4 sm:$0xff]   ;;  %v5620_v0 = vld [vmem:[#allocation11 + $0x1a0] ss:$28 sps:$4 sm:$0xff]  }
 0x44c   :  { %3986 = vmatprep.subr.bf16.mxu1 %v5553_v1  ;;  %4068 = vmatprep.subr.bf16.mxu0 %v5556_v3  ;;  %v5623_v1 = vld [vmem:[#allocation11 + $0x1d4] ss:$28 sps:$4 sm:$0xff]  }
 0x44d   :  { %v5624_v3 = vld [vmem:[#allocation11 + $0x558] ss:$28 sps:$4 sm:$0xff]  }
 0x44f   :  { %3987 = vmatpush1.bf16.msra.mxu1 %v5551_v2  ;;  %4069 = vmatpush1.bf16.msra.mxu0 %v5554_v4  ;;  %v5621_v2 = vld [vmem:[#allocation11 + $0x1d0] ss:$28 sps:$4 sm:$0xff]   ;;  %v5625_v4 = vld [vmem:[#allocation11 + $0x398] ss:$28 sps:$4 sm:$0xff]  }
 0x450   :  { %3988 = vmatprep.subr.bf16.mxu1 %v5559_v5  ;;  %4070 = vmatprep.subr.bf16.mxu0 %v5562_v7  ;;  %v5628_v5 = vld [vmem:[#allocation11 + $0x20c] ss:$28 sps:$4 sm:$0xff]  }
 0x451   :  { %v5629_v7 = vld [vmem:[#allocation11 + $0x590] ss:$28 sps:$4 sm:$0xff]  }
 0x453   :  { %3989 = vmatpush1.bf16.msra.mxu1 %v5557_v8  ;;  %4071 = vmatpush1.bf16.msra.mxu0 %v5560_v10  ;;  %v5626_v8 = vld [vmem:[#allocation11 + $0x208] ss:$28 sps:$4 sm:$0xff]   ;;  %v5630_v10 = vld [vmem:[#allocation11 + $0x3d0] ss:$28 sps:$4 sm:$0xff]  }
 0x454   :  { %3990 = vmatprep.subr.bf16.mxu1 %v5565_v17  ;;  %4072 = vmatprep.subr.bf16.mxu0 %v5568_v11  ;;  %v5633_v17 = vld [vmem:[#allocation11 + $0x244] ss:$28 sps:$4 sm:$0xff]  }
 0x455   :  { %v5634_v11 = vld [vmem:[#allocation11 + $0x5c8] ss:$28 sps:$4 sm:$0xff]  }
 0x457   :  { %3991 = vmatpush1.bf16.msra.mxu1 %v5563_v13  ;;  %4073 = vmatpush1.bf16.msra.mxu0 %v5566_v14  ;;  %v5635_v13 = vld [vmem:[#allocation11 + $0x408] ss:$28 sps:$4 sm:$0xff]   ;;  %v5638_v14 = vld [vmem:[#allocation11 + $0x27c] ss:$28 sps:$4 sm:$0xff]  }
 0x458   :  { %3992 = vmatprep.subr.bf16.mxu1 %v5571_v15  ;;  %4074 = vmatprep.subr.bf16.mxu0 %v5574_v16  ;;  %v5639_v15 = vld [vmem:[#allocation11 + $0x600] ss:$28 sps:$4 sm:$0xff]   ;;  %v5636_v16 = vld [vmem:[#allocation11 + $0x278] ss:$28 sps:$4 sm:$0xff]  }
 0x45b   :  { %3993 = vmatpush1.bf16.msra.mxu1 %v5569_v19  ;;  %4075 = vmatpush1.bf16.msra.mxu0 %v5572_v20  ;;  %v5643_v19 = vld [vmem:[#allocation11 + $0x2b4] ss:$28 sps:$4 sm:$0xff]  }
 0x45c   :  { %3994 = vmatprep.subr.bf16.mxu1 %v5577_v21  ;;  %4076 = vmatprep.subr.bf16.mxu0 %v5580_v22  ;;  %v5644_v20 = vld [vmem:[#allocation11 + $0x638] ss:$28 sps:$4 sm:$0xff]   ;;  %v5641_v21 = vld [vmem:[#allocation11 + $0x2b0] ss:$28 sps:$4 sm:$0xff]  }
 0x45d   :  { %v5645_v22 = vld [vmem:[#allocation11 + $0x478] ss:$28 sps:$4 sm:$0xff]  }
 0x45f   :  { %3995 = vmatpush1.bf16.msra.mxu1 %v5575_v53  ;;  %4077 = vmatpush1.bf16.msra.mxu0 %v5578_v24  ;;  %v5649_v53 = vld [vmem:[#allocation11 + $0x670] ss:$28 sps:$4 sm:$0xff]   ;;  %v5646_v24 = vld [vmem:[#allocation11 + $0x2e8] ss:$28 sps:$4 sm:$0xff]  }
 0x460   :  { %4087 = vmatprep.subr.bf16.mxu1 %v5583_v25  ;;  %4840 = vmatprep.subr.bf16.mxu0 %v5584_v26  ;;  %v5650_v25 = vld [vmem:[#allocation11 + $0x4b0] ss:$28 sps:$4 sm:$0xff]   ;;  %v5653_v26 = vld [vmem:[#allocation11 + $0x324] ss:$28 sps:$4 sm:$0xff]  }
 0x462   :  { %3997 = vmatmul.mubr.bf16.vlgmr.msra.gmra.mrb[12].mxu1 %v6134_v29  ;;  %4079 = vmatmul.mubr.bf16.vlgmr.msra.gmra.mrb[8].mxu0 %v6134_v29 }
 0x463   :  { %4088 = vmatpush1.bf16.msra.mxu1 %v5581_v28  ;;  %4119 = vmatprep.mubr.bf16.mxu1 %v6115_v6  ;;  %v5651_v28 = vld [vmem:[#allocation11 + $0x320] ss:$28 sps:$4 sm:$0xff]  }
 0x464   :  { %4841 = vmatpush3.bf16.msra.mxu0 %v5585_v30  ;;  %4201 = vmatprep.mubr.bf16.mxu0 %v6115_v6  ;;  %v5604_v6 = vld [vmem:[#allocation11 + $0x2b8] ss:$28 sps:$4 sm:$0xff]   ;;  %v5655_v30 = vld [vmem:[#allocation11 + $0x4e8] ss:$28 sps:$4 sm:$0xff]  }
 0x465   :  { %4089 = vmatprep.subr.bf16.mxu1 %v5588_v31  ;;  %4842 = vmatprep.subr.bf16.mxu0 %v5589_v32  ;;  %v5658_v31 = vld [vmem:[#allocation11 + $0x35c] ss:$28 sps:$4 sm:$0xff]  }
 0x466   :  { %v5659_v32 = vld [vmem:[#allocation11 + $0x6e0] ss:$28 sps:$4 sm:$0xff]  }
 0x467   :  { %4090 = vmatpush1.bf16.msra.mxu1 %v5586_v33  ;;  %v5656_v33 = vld [vmem:[#allocation11 + $0x358] ss:$28 sps:$4 sm:$0xff]  }
 0x468   :  { %4843 = vmatpush3.bf16.msra.mxu0 %v5590_v34  ;;  %4091 = vmatprep.subr.bf16.mxu1 %v5593_v35  ;;  %v5660_v34 = vld [vmem:[#allocation11 + $0x520] ss:$28 sps:$4 sm:$0xff]   ;;  %v5663_v35 = vld [vmem:[#allocation11 + $0x394] ss:$28 sps:$4 sm:$0xff]  }
 0x469   :  { %4844 = vmatprep.subr.bf16.mxu0 %v5594_v36  ;;  %v5661_v36 = vld [vmem:[#allocation11 + $0x390] ss:$28 sps:$4 sm:$0xff]  }
 0x46b   :  { %4092 = vmatpush1.bf16.msra.mxu1 %v5591_v37  ;;  %v5666_v37 = vld [vmem:[#allocation11 + $0x3cc] ss:$28 sps:$4 sm:$0xff]  }
 0x46c   :  { %4845 = vmatpush3.bf16.msra.mxu0 %v5595_v38  ;;  %4093 = vmatprep.subr.bf16.mxu1 %v5598_v39  ;;  %v5664_v38 = vld [vmem:[#allocation11 + $0x3c8] ss:$28 sps:$4 sm:$0xff]  }
 0x46d   :  { %4846 = vmatprep.subr.bf16.mxu0 %v5599_v40  ;;  %v5669_v39 = vld [vmem:[#allocation11 + $0x404] ss:$28 sps:$4 sm:$0xff]  }
 0x46e   :  { %v5667_v40 = vld [vmem:[#allocation11 + $0x400] ss:$28 sps:$4 sm:$0xff]  }
 0x46f   :  { %4094 = vmatpush1.bf16.msra.mxu1 %v5596_v41  ;;  %v5672_v41 = vld [vmem:[#allocation11 + $0x43c] ss:$28 sps:$4 sm:$0xff]  }
 0x470   :  { %4847 = vmatpush3.bf16.msra.mxu0 %v5600_v42  ;;  %4095 = vmatprep.subr.bf16.mxu1 %v5603_v43  ;;  %v5670_v42 = vld [vmem:[#allocation11 + $0x438] ss:$28 sps:$4 sm:$0xff]  }
 0x471   :  { %4848 = vmatprep.subr.bf16.mxu0 %v5604_v6  ;;  %v5675_v43 = vld [vmem:[#allocation11 + $0x474] ss:$28 sps:$4 sm:$0xff]  }
 0x472   :  { %v5673_v6 = vld [vmem:[#allocation11 + $0x470] ss:$28 sps:$4 sm:$0xff]  }
 0x473   :  { %4096 = vmatpush1.bf16.msra.mxu1 %v5601_v44  ;;  %v5676_v44 = vld [vmem:[#allocation11 + $0x4a8] ss:$28 sps:$4 sm:$0xff]  }
 0x474   :  { %4849 = vmatpush3.bf16.msra.mxu0 %v5605_v45  ;;  %4097 = vmatprep.subr.bf16.mxu1 %v5608_v47  ;;  %v5681_v45 = vld [vmem:[#allocation11 + $0x4e4] ss:$28 sps:$4 sm:$0xff]   ;;  %v5684_v47 = vld [vmem:[#allocation11 + $0x51c] ss:$28 sps:$4 sm:$0xff]  }
 0x475   :  { %4850 = vmatprep.subr.bf16.mxu0 %v5609_v48  ;;  %v5682_v48 = vld [vmem:[#allocation11 + $0x518] ss:$28 sps:$4 sm:$0xff]  }
 0x477   :  { %4098 = vmatpush1.bf16.msra.mxu1 %v5606_v50  ;;  %v5687_v50 = vld [vmem:[#allocation11 + $0x554] ss:$28 sps:$4 sm:$0xff]  }
 0x478   :  { %4851 = vmatpush3.bf16.msra.mxu0 %v5610_v51  ;;  %4099 = vmatprep.subr.bf16.mxu1 %v5613_v52  ;;  %v5685_v51 = vld [vmem:[#allocation11 + $0x550] ss:$28 sps:$4 sm:$0xff]  }
 0x479   :  { %4852 = vmatprep.subr.bf16.mxu0 %v5614_v54  ;;  %v5690_v52 = vld [vmem:[#allocation11 + $0x58c] ss:$28 sps:$4 sm:$0xff]  }
 0x47a   :  { %v5688_v54 = vld [vmem:[#allocation11 + $0x588] ss:$28 sps:$4 sm:$0xff]  }
 0x47b   :  { %4100 = vmatpush1.bf16.msra.mxu1 %v5611_v55  ;;  %v5693_v55 = vld [vmem:[#allocation11 + $0x5c4] ss:$28 sps:$4 sm:$0xff]  }
 0x47c   :  { %4853 = vmatpush3.bf16.msra.mxu0 %v5615_v56  ;;  %4101 = vmatprep.subr.bf16.mxu1 %v5618_v62  ;;  %v5691_v56 = vld [vmem:[#allocation11 + $0x5c0] ss:$28 sps:$4 sm:$0xff]  }
 0x47d   :  { %4854 = vmatprep.subr.bf16.mxu0 %v5619_v63  ;;  %v5696_v62 = vld [vmem:[#allocation11 + $0x5fc] ss:$28 sps:$4 sm:$0xff]  }
 0x47e   :  { %v5694_v63 = vld [vmem:[#allocation11 + $0x5f8] ss:$28 sps:$4 sm:$0xff]  }
 0x47f   :  { %4102 = vmatpush1.bf16.msra.mxu1 %v5616_v59  ;;  %v5699_v59 = vld [vmem:[#allocation11 + $0x634] ss:$28 sps:$4 sm:$0xff]  }
 0x480   :  { %4855 = vmatpush3.bf16.msra.mxu0 %v5620_v0  ;;  %4103 = vmatprep.subr.bf16.mxu1 %v5623_v1  ;;  %v5697_v0 = vld [vmem:[#allocation11 + $0x630] ss:$28 sps:$4 sm:$0xff]  }
 0x481   :  { %4862 = vmatprep.subr.bf16.mxu0 %v5624_v3  ;;  %v5702_v1 = vld [vmem:[#allocation11 + $0x66c] ss:$28 sps:$4 sm:$0xff]  }
 0x482   :  { %v5700_v3 = vld [vmem:[#allocation11 + $0x668] ss:$28 sps:$4 sm:$0xff]  }
 0x483   :  { %4202 = vmatmul.mubr.bf16.vlgmr.msra.gmra.mrb[12].mxu0 %v6117_v9  ;;  %4104 = vmatpush1.bf16.msra.mxu1 %v5621_v2  ;;  %v5705_v2 = vld [vmem:[#allocation11 + $0x6a4] ss:$28 sps:$4 sm:$0xff]  }
 0x484   :  { %4863 = vmatpush3.bf16.msra.mxu0 %v5625_v4  ;;  %4241 = vmatprep.mubr.bf16.mxu0 %v6127_v49  ;;  %v5703_v4 = vld [vmem:[#allocation11 + $0x6a0] ss:$28 sps:$4 sm:$0xff]  }
 0x485   :  { %4105 = vmatprep.subr.bf16.mxu1 %v5628_v5  ;;  %4864 = vmatprep.subr.bf16.mxu0 %v5629_v7  ;;  %v5708_v5 = vld [vmem:[#allocation11 + $0x6dc] ss:$28 sps:$4 sm:$0xff]  }
 0x486   :  { %v5706_v7 = vld [vmem:[#allocation11 + $0x6d8] ss:$28 sps:$4 sm:$0xff]  }
 0x487   :  { %4106 = vmatpush1.bf16.msra.mxu1 %v5626_v8  ;;  %v2734_v8 = vld [vmem:[%s6189_s9] sm:$0xff]  ;;  %s5912_s9 = smov [#allocation14]  }
 0x488   :  { %4865 = vmatpush3.bf16.msra.mxu0 %v5630_v10  ;;  %4107 = vmatprep.subr.bf16.mxu1 %v5633_v17  ;;  %v2739_v10 = vrot.slane %v2734_v8, %v6073_v58  ;;  %v2747_v17 = vrot.slane %v2734_v8, %v6095_v46  ;;  %s4298_s4 = sshll.u32 %s5912_s9, 4  ;;  %s4299_s4 = int_to_ptr.vmem [resolvable:$true] %s4298_s4 }
 0x489   :  { %4866 = vmatprep.subr.bf16.mxu0 %v5634_v11  ;;  %v2743_v11 = vrot.slane %v2734_v8, %v6081_v60  ;;  %s5843_s20 = scalar_lea.vmem %s4299_s4, 256  ;;  %p5848_p7 = scmp.lt.s32.totalorder %s4299_s4, %s4299_s4 }
 0x48a   :  { %p5844_p6 = scmp.ne.s32.totalorder %s4299_s4, %s5843_s20  ;;  %p5849_p8 = scmp.lt.s32.totalorder %s5843_s20, %s5843_s20 }
 0x48b   :  { %4108 = vmatpush1.bf16.msra.mxu1 %v5631_v12  ;;  %v2751_v12 = vrot.slane %v2734_v8, %v6084_v61 }
 0x48c   :  { %4867 = vmatpush3.bf16.msra.mxu0 %v5635_v13  ;;  %4109 = vmatprep.subr.bf16.mxu1 %v5638_v14  ;;  %p5850_p9 = por %p5849_p8, %p5848_p7 }
 0x48d   :  { %4868 = vmatprep.subr.bf16.mxu0 %v5639_v15 }
 0x48e   :  { %p5851_p10 = pnand %p5850_p9, %p5844_p6 }
 0x48f   :  { %4110 = vmatpush1.bf16.msra.mxu1 %v5636_v16 }
 0x490   :  { %4869 = vmatpush3.bf16.msra.mxu0 %v5640_v18  ;;  %4111 = vmatprep.subr.bf16.mxu1 %v5643_v19 }
 0x491   :  { %4870 = vmatprep.subr.bf16.mxu0 %v5644_v20 }
 0x493   :  { %4112 = vmatpush1.bf16.msra.mxu1 %v5641_v21 }
 0x494   :  { %4871 = vmatpush3.bf16.msra.mxu0 %v5645_v22  ;;  %4113 = vmatprep.subr.bf16.mxu1 %v5648_v23 }
 0x495   :  { %4872 = vmatprep.subr.bf16.mxu0 %v5649_v53 }
 0x497   :  { %4114 = vmatpush1.bf16.msra.mxu1 %v5646_v24 }
 0x498   :  { %4873 = vmatpush3.bf16.msra.mxu0 %v5650_v25  ;;  %4115 = vmatprep.subr.bf16.mxu1 %v5653_v26 }
 0x499   :  { %4874 = vmatprep.subr.bf16.mxu0 %v5654_v27 }
 0x49b   :  { %4116 = vmatpush1.bf16.msra.mxu1 %v5651_v28 }
 0x49c   :  { %4875 = vmatpush3.bf16.msra.mxu0 %v5655_v30  ;;  %4117 = vmatprep.subr.bf16.mxu1 %v5658_v31 }
 0x49d   :  { %4876 = vmatprep.subr.bf16.mxu0 %v5659_v32 }
 0x49f   :  { %4118 = vmatpush1.bf16.msra.mxu1 %v5656_v33 }
 0x4a0   :  { %4877 = vmatpush3.bf16.msra.mxu0 %v5660_v34  ;;  %4128 = vmatprep.subr.bf16.mxu1 %v5663_v35 }
 0x4a2   :  { %4120 = vmatmul.mubr.bf16.vlgmr.msra.gmra.mrb[16].mxu1 %v6117_v9  ;;  %v5678_v9 = vld [vmem:[#allocation11 + $0x4ac] ss:$28 sps:$4 sm:$0xff]  }
 0x4a3   :  { %4242 = vmatmul.mubr.bf16.vlgmr.msra.gmra.mrb[16].mxu0 %v6134_v29  ;;  %4129 = vmatpush1.bf16.msra.mxu1 %v5661_v36 }
 0x4a4   :  { %4160 = vmatprep.mubr.bf16.mxu1 %v6127_v49  ;;  %4130 = vmatprep.subr.bf16.mxu1 %v5666_v37  ;;  %v5679_v49 = vld [vmem:[#allocation11 + $0x4e0] ss:$28 sps:$4 sm:$0xff]  }
 0x4a7   :  { %4131 = vmatpush1.bf16.msra.mxu1 %v5664_v38 }
 0x4a8   :  { %4132 = vmatprep.subr.bf16.mxu1 %v5669_v39 }
 0x4ab   :  { %4133 = vmatpush1.bf16.msra.mxu1 %v5667_v40 }
 0x4ac   :  { %4134 = vmatprep.subr.bf16.mxu1 %v5672_v41 }
 0x4af   :  { %4135 = vmatpush1.bf16.msra.mxu1 %v5670_v42 }
 0x4b0   :  { %4136 = vmatprep.subr.bf16.mxu1 %v5675_v43 }
 0x4b3   :  { %4137 = vmatpush1.bf16.msra.mxu1 %v5673_v6 }
 0x4b4   :  { %4138 = vmatprep.subr.bf16.mxu1 %v5678_v9 }
 0x4b7   :  { %4139 = vmatpush1.bf16.msra.mxu1 %v5676_v44 }
 0x4b8   :  { %4140 = vmatprep.subr.bf16.mxu1 %v5681_v45 }
 0x4bb   :  { %4141 = vmatpush1.bf16.msra.mxu1 %v5679_v49 }
 0x4bc   :  { %4142 = vmatprep.subr.bf16.mxu1 %v5684_v47 }
 0x4bf   :  { %4143 = vmatpush1.bf16.msra.mxu1 %v5682_v48 }
 0x4c0   :  { %4144 = vmatprep.subr.bf16.mxu1 %v5687_v50 }
 0x4c3   :  { %4145 = vmatpush1.bf16.msra.mxu1 %v5685_v51 }
 0x4c4   :  { %4146 = vmatprep.subr.bf16.mxu1 %v5690_v52 }
 0x4c7   :  { %4147 = vmatpush1.bf16.msra.mxu1 %v5688_v54 }
 0x4c8   :  { %4148 = vmatprep.subr.bf16.mxu1 %v5693_v55 }
 0x4cb   :  { %4149 = vmatpush1.bf16.msra.mxu1 %v5691_v56 }
 0x4cc   :  { %4150 = vmatprep.subr.bf16.mxu1 %v5696_v62 }
 0x4cf   :  { %4151 = vmatpush1.bf16.msra.mxu1 %v5694_v63 }
 0x4d0   :  { %4152 = vmatprep.subr.bf16.mxu1 %v5699_v59 }
 0x4d3   :  { %4153 = vmatpush1.bf16.msra.mxu1 %v5697_v0 }
 0x4d4   :  { %4154 = vmatprep.subr.bf16.mxu1 %v5702_v1 }
 0x4d7   :  { %4155 = vmatpush1.bf16.msra.mxu1 %v5700_v3 }
 0x4d8   :  { %4156 = vmatprep.subr.bf16.mxu1 %v5705_v2 }
 0x4db   :  { %4157 = vmatpush1.bf16.msra.mxu1 %v5703_v4 }
 0x4dc   :  { %4158 = vmatprep.subr.bf16.mxu1 %v5708_v5 }
 0x4df   :  { %4159 = vmatpush1.bf16.msra.mxu1 %v5706_v7 }
 0x4e2   :  { %4161 = vmatmul.mubr.bf16.vlgmr.msra.gmra.mrb[16].mxu1 %v6134_v29 }
 0x535   :  { %v3998_v13 = vpop.f32.mrb[12].mxu1  ;;  %v4080_v14 = vpop.f32.mrb[8].mxu0 }
 0x536   :  { %v4890_v15 = vadd.f32 %v3998_v13, %v2739_v10  ;;  %v4892_v16 = vadd.f32 %v4080_v14, %v2747_v17  ;;  %v4000_v18 = vpop.f32.mrb[13].mxu1  ;;  %v4082_v19 = vpop.f32.mrb[9].mxu0 }
 0x537   :  { %v4891_v20 = vadd.f32 %v4000_v18, %v2743_v11  ;;  %v4893_v29 = vadd.f32 %v4082_v19, %v2751_v12  ;;  %v4002_v21 = vpop.f32.mrb[14].mxu1  ;;  %v4084_v22 = vpop.f32.mrb[10].mxu0 }
 0x538   :  { %v4003_v23 = vpop.f32.mrb[15].mxu1  ;;  %v4085_v53 = vpop.f32.mrb[11].mxu0 }
 0x539   :  { %v4836_v24 = vpack.c.bf16 %v4891_v20, %v4890_v15  ;;  %v4837_v58 = vpack.c.bf16 %v4893_v29, %v4892_v16 }
 0x53b   :  { %4278 = vst [vmem:[#allocation13] sm:$0xff] %v4836_v24  ;;  %4279 = vst [vmem:[#allocation13 + $0x8] sm:$0xff] %v4837_v58 }
 0x53c   :  { %5854 = shalt.err (!%p5851_p10)
}
 0x53d   :  { %s5855_s19 = scalar_lea.hbm %s6191_s11, 256 }
 0x53e   :  { %p5856_p11 = scmp.ne.s32.totalorder %s6191_s11, %s5855_s19  ;;  %p5859_p12 = scmp.lt.u32.totalorder %s5855_s19, %s6191_s11 }
 0x540   :  { %p5861_p13 = pnand %p5859_p12, %p5856_p11 }
 0x542   :  { %5864 = shalt.err (!%p5861_p13)
}
 0x543   :  { %4301 = dma.vmem_to_hbm [thread:$0]  %s4299_s4, 256, %s6191_s11, [#allocation15]   ;;  %v2762_v27 = vsub.s32 6, %v6070_v57  ;;  %v2754_v38 = vsub.s32 4, %v6070_v57  ;;  %v2758_v39 = vsub.s32 5, %v6070_v57 }
 0x544   :  { %s5913_s11 = smov [#allocation13]  }
 0x545   :  { %v2763_v28 = vrot.slane %v2734_v8, %v2762_v27  ;;  %v2755_v40 = vrot.slane %v2734_v8, %v2754_v38  ;;  %v2759_v41 = vrot.slane %v2734_v8, %v2758_v39  ;;  %s4288_s23 = sshll.u32 %s5913_s11, 4  ;;  %s4289_s23 = int_to_ptr.vmem [resolvable:$true] %s4288_s23 }
 0x546   :  { %s5865_s24 = scalar_lea.vmem %s4289_s23, 448  ;;  %p5870_p1 = scmp.lt.s32.totalorder %s4289_s23, %s4289_s23 }
 0x547   :  { %p5866_p0 = scmp.ne.s32.totalorder %s4289_s23, %s5865_s24  ;;  %p5871_p2 = scmp.lt.s32.totalorder %s5865_s24, %s5865_s24 }
 0x549   :  { %p5872_p3 = por %p5871_p2, %p5870_p1 }
 0x54b   :  { %p5873_p4 = pnand %p5872_p3, %p5866_p0 }
 0x556   :  { %v4856_v60 = vpop.f32.mrb[12].mxu0 }
 0x557   :  { %v4857_v61 = vpop.f32.mrb[13].mxu0 }
 0x558   :  { %v4858_v46 = vadd.f32 %v4857_v61, %v4856_v60  ;;  %v4859_v25 = vpop.f32.mrb[14].mxu0 }
 0x559   :  { %v4860_v26 = vpop.f32.mrb[15].mxu0 }
 0x55a   :  { %v4204_v32 = vadd.f32 %v4858_v46, %v2763_v28 }
 0x576   :  { %v4878_v30 = vpop.f32.mrb[16].mxu0 }
 0x577   :  { %v4879_v31 = vpop.f32.mrb[17].mxu0 }
 0x578   :  { %v4880_v33 = vadd.f32 %v4879_v31, %v4878_v30  ;;  %v4881_v34 = vpop.f32.mrb[18].mxu0 }
 0x579   :  { %v4882_v35 = vpop.f32.mrb[19].mxu0 }
 0x57a   :  { %v4244_v36 = vadd.f32 %v4880_v33, %v4204_v32 }
 0x57c   :  { %v4839_v37 = vpack.c.bf16 %v4244_v36, %v4244_v36 }
 0x57e   :  { %4281 = vst [vmem:[#allocation13 + $0x18] sm:$0xf] %v4839_v37 }
 0x5b5   :  { %v4162_v42 = vpop.f32.mrb[16].mxu1 }
 0x5b6   :  { %v4894_v43 = vadd.f32 %v4162_v42, %v2755_v40  ;;  %v4164_v6 = vpop.f32.mrb[17].mxu1 }
 0x5b7   :  { %v4895_v9 = vadd.f32 %v4164_v6, %v2759_v41  ;;  %v4166_v44 = vpop.f32.mrb[18].mxu1 }
 0x5b8   :  { %v4167_v45 = vpop.f32.mrb[19].mxu1 }
 0x5b9   :  { %v4838_v49 = vpack.c.bf16 %v4895_v9, %v4894_v43 }
 0x5bb   :  { %4280 = vst [vmem:[#allocation13 + $0x10] sm:$0xff] %v4838_v49 }
 0x5bc   :  { %5876 = shalt.err (!%p5873_p4)
}
 0x5bd   :  { %s5877_s29 = scalar_lea.hbm %s6190_s10, 448 }
 0x5be   :  { %p5878_p5 = scmp.ne.s32.totalorder %s6190_s10, %s5877_s29  ;;  %p5881_p6 = scmp.lt.u32.totalorder %s5877_s29, %s6190_s10 }
 0x5c0   :  { %p5883_p7 = pnand %p5881_p6, %p5878_p5 }
 0x5c2   :  { %5886 = shalt.err (!%p5883_p7)
}
 0x5c3   :  { %4291 = dma.vmem_to_hbm [thread:$0]  %s4289_s23, 448, %s6190_s10, [#allocation4]  }
 0x5c4   :  { %5895 = dma.done.wait [#allocation4], 448  }
 0x5c5   :  { %5896 = vsyncadd [#allocation4], 4294966848 }
 0x5c6   :  { %5897 = dma.done.wait [#allocation15], 256  }
 0x5c7   :  { %5898 = vsyncadd [#allocation15], 4294967040 }
 0x5c8   :  { %4308 = vsyncpa [#allocation3], 1 }
 0x5c9   :  { %4309 = vsyncpa [#allocation6], 1 }
 0x5ca   :  { %4310 = vsyncpa [#allocation9], 1 }
 0x5cb   :  { %4311 = vsyncpa [#allocation12], 1 }
 0x5cc   :  { %4312 = vsyncpa [#allocation4], 1 }
 0x5cd   :  { %4313 = vsyncpa [#allocation15], 1 }

</bundles_post_ra>
